<compile_context>
chip_gen: v6e
topology: v6e:2x2x1
jax: 0.10.0
libtpu: 0.0.40
codegen_flags: <defaults>
</compile_context>

<pallas_src>
import math
import numpy as np
import jax
import jax.numpy as jnp
from jax.experimental import pallas as pl
from jax.experimental.pallas import tpu as pltpu


# -----------------------------------------------------------------------------
# Clebsch-Gordan coefficients <l1 m1 l2 m2 | l m>  (Racah formula)
# -----------------------------------------------------------------------------
def clebsch_gordan(l1, m1, l2, m2, l, m):
    if m1 + m2 != m:
        return 0.0
    if l < abs(l1 - l2) or l > l1 + l2:
        return 0.0
    if abs(m1) > l1 or abs(m2) > l2 or abs(m) > l:
        return 0.0
    f = math.factorial
    pref = math.sqrt(
        (2 * l + 1)
        * f(l + l1 - l2) * f(l - l1 + l2) * f(l1 + l2 - l)
        / f(l1 + l2 + l + 1)
    )
    pref *= math.sqrt(
        f(l + m) * f(l - m) * f(l1 + m1) * f(l1 - m1) * f(l2 + m2) * f(l2 - m2)
    )
    k_min = max(0, l2 - l - m1, l1 + m2 - l)
    k_max = min(l1 + l2 - l, l1 - m1, l2 + m2)
    s = 0.0
    for k in range(k_min, k_max + 1):
        s += ((-1) ** k) / (
            f(k) * f(l1 + l2 - l - k) * f(l1 - m1 - k) * f(l2 + m2 - k)
            * f(l - l2 + m1 + k) * f(l - l1 - m2 + k)
        )
    return pref * s


def _round_up(x, m):
    return ((x + m - 1) // m) * m


def _vmem_capacity_bytes():
    """Physical VMEM per TensorCore (v5e/v6e: 128 MiB, v7x: 64 MiB)."""
    try:
        return int(pltpu.get_tpu_info().vmem_capacity_bytes)
    except Exception:
        return 64 << 20   # conservative fallback (v7x)


# -----------------------------------------------------------------------------
# Tiling plan (per-generation VMEM budgets, feedback #6/#7/#8/#9/#10)
# -----------------------------------------------------------------------------
def _plan_tiles(S, n_in_p, n_out_p):
    cap = _vmem_capacity_bytes()
    # ~40% of physical VMEM for the kernel working set (pipeline headroom):
    # ~26 MiB on v7x, capped at 48 MiB on 128 MiB parts (v5e/v6e).
    tile_budget = max(8 << 20, min(48 << 20, (2 * cap) // 5))

    # Batch tile: multiple of 16 (bf16 sublane packing); don't pad tiny batches
    # past the next multiple of 16 (padded rows only add MXU cycles).
    bt = min(256, _round_up(S, 16))
    S_p = _round_up(S, bt)
    n_bt = S_p // bt

    # n_out tiling: a single lane tile unless the batch axis cannot feed a second
    # TensorCore (v7x megacore); then split n_out into two parallel lane tiles.
    if n_bt >= 2 or n_out_p <= 128 or (n_out_p // 2) % 128 != 0:
        tn = n_out_p
    else:
        tn = n_out_p // 2
    n_jt = n_out_p // tn

    K_tot = n_in_p * n_in_p
    # Keep W resident in VMEM when it fits comfortably (2x for worst-case buffering).
    w_resident = (2 * K_tot * n_out_p * 2) <= tile_budget // 2

    fixed = (2 * K_tot * n_out_p * 2) if w_resident else 0   # resident bf16 W
    fixed += 4 * 2 * bt * n_in_p * 2                          # 4 bf16 operand slabs, 2 bufs
    fixed += 2 * bt * tn * 4                                  # f32 output buffers

    def cost(t):
        kb = t * n_in_p
        c = fixed + bt * kb * 2                               # bf16 LHS scratch
        if not w_resident:
            c += 2 * kb * tn * 2                              # double-buffered bf16 W block
        return c

    # i-block size: divides n_in_p, K_blk = ti*n_in_p a multiple of 128 (lane-dense
    # MXU contraction), largest that fits the budget.
    ti = None
    for t in range(1, n_in_p + 1):
        if n_in_p % t or (t * n_in_p) % 128:
            continue
        if ti is None or cost(t) <= tile_budget:
            ti = t
    k_blk = ti * n_in_p
    n_gt = n_in_p // ti

    need = cost(ti)
    vmem_limit = int(min(cap - (8 << 20), max(32 << 20, 2 * need)))
    vmem_limit = max(vmem_limit, need + (4 << 20))
    return bt, S_p, n_bt, tn, n_jt, ti, k_blk, n_gt, w_resident, vmem_limit


# -----------------------------------------------------------------------------
# Pallas kernel
#   Grid = (batch tiles [parallel], n_out tiles [parallel], i-blocks [arbitrary, last])
#   Per grid step:
#     - build the (bt, k_blk) bilinear LHS in a bf16 VMEM scratch (no host-expanded
#       O(n_in^2) operands are streamed),
#     - one lane-dense MXU matmul  (bt, k_blk) @ (k_blk, tn)  with f32 accumulation
#       into an output block that stays resident across the reduction axis.
# -----------------------------------------------------------------------------
def _make_cg_kernel(ti, n_in_p, w_resident):
    def kernel(cr_ref, ci_ref, a_ref, b_ref, w_ref, o_ref, p_ref):
        j = pl.program_id(1)
        g = pl.program_id(2)

        @pl.when(g == 0)
        def _init():
            o_ref[...] = jnp.zeros_like(o_ref)

        # Build the (bt, k_blk) LHS: for channel i of this K-block, broadcast x_i
        # across the j lanes and fuse the complex product.  Rows are
        # [real | imag]-stacked so one expression covers both:
        #   real rows: xr_i*xr_j + xi_i*(-xi_j)     imag rows: xr_i*xi_j + xi_i*xr_j
        # All elementwise math in bf16 (VALU relief on v6e/v7x; MXU input is bf16
        # anyway).  TODO(synk): f32 VALU path for v5e (no native bf16 VALU).
        a = a_ref[...]                       # (bt, n_in_p) bf16, "j" operand, term 1
        b = b_ref[...]                       # (bt, n_in_p) bf16, "j" operand, term 2
        for ii in range(ti):                 # TODO(synk): fori_loop for very large ti
            p_ref[:, ii * n_in_p:(ii + 1) * n_in_p] = (
                cr_ref[:, ii:ii + 1] * a + ci_ref[:, ii:ii + 1] * b)

        if w_resident:
            w = w_ref[j, g]                  # (k_blk, tn): resident W, no re-streaming
        else:
            w = w_ref[...]                   # (k_blk, tn): streamed block
        o_ref[...] += jnp.dot(p_ref[...], w, preferred_element_type=jnp.float32)

    return kernel


def cg_forward_pallas(activations, w_flat, n_in, n_in_p, n_out, n_out_p):
    """activations: (B, n_in, 2) float -> (B, n_out, 2), straight cumu_tm_FF layout."""
    B = activations.shape[0]
    assert activations.shape[1] == n_in
    S = 2 * B                                 # stacked rows: [real | imag]

    (bt, S_p, n_bt, tn, n_jt, ti, k_blk, n_gt, w_resident,
     vmem_limit) = _plan_tiles(S, n_in_p, n_out_p)

    x = activations.astype(jnp.float32)
    xr = jnp.pad(x[:, :, 0], ((0, 0), (0, n_in_p - n_in)))
    xi = jnp.pad(x[:, :, 1], ((0, 0), (0, n_in_p - n_in)))

    # Stacked operands so real and imag outputs come from one fused matmul:
    #   rows [0,B)  : Re(x_i x_j) = xr_i*xr_j + xi_i*(-xi_j)
    #   rows [B,2B) : Im(x_i x_j) = xr_i*xi_j + xi_i*( xr_j)
    cr = jnp.concatenate([xr, xr], axis=0)    # "i" coefficient, term 1
    ci = jnp.concatenate([xi, xi], axis=0)    # "i" coefficient, term 2
    a = jnp.concatenate([xr, xi], axis=0)     # "j" operand, term 1
    b = jnp.concatenate([-xi, xr], axis=0)    # "j" operand, term 2
    if S_p > S:
        pad = ((0, S_p - S), (0, 0))
        cr, ci, a, b = (jnp.pad(t, pad) for t in (cr, ci, a, b))

    # Stream activations as bf16 (feedback: bf16 operands + bf16 elementwise path).
    a = a.astype(jnp.bfloat16)
    b = b.astype(jnp.bfloat16)
    # "i" coefficients re-laid out as (n_gt, S_p, ti) so each K-block's channels
    # arrive as a static-lane block (last dim == full array dim; avoids dynamic
    # lane slicing inside the kernel).
    cr_blk = cr.astype(jnp.bfloat16).reshape(S_p, n_gt, ti).transpose(1, 0, 2)
    ci_blk = ci.astype(jnp.bfloat16).reshape(S_p, n_gt, ti).transpose(1, 0, 2)

    # W host layout (n_jt, n_gt, k_blk, tn): K-blocks / n_out tiles as leading dims
    # so the kernel addresses them with cheap leading-dim indices.
    w4 = w_flat.reshape(n_gt, k_blk, n_jt, tn).transpose(2, 0, 1, 3)

    if w_resident:
        # Constant-index full block: DMA'd once, stays resident -> no re-streaming
        # across batch tiles / n_out tiles / K blocks.
        w_spec = pl.BlockSpec((n_jt, n_gt, k_blk, tn), lambda bb, jj, gg: (0, 0, 0, 0))
    else:
        # NOTE: pipeline_mode=pl.Buffered(3) here would deepen the W stream if a
        # trace shows exposed DMA; left at the default depth.
        w_spec = pl.BlockSpec((None, None, k_blk, tn), lambda bb, jj, gg: (jj, gg, 0, 0))

    grid = (n_bt, n_jt, n_gt)

    out = pl.pallas_call(
        _make_cg_kernel(ti, n_in_p, w_resident),
        out_shape=jax.ShapeDtypeStruct((S_p, n_out_p), jnp.float32),
        grid_spec=pltpu.PrefetchScalarGridSpec(
            num_scalar_prefetch=0,
            grid=grid,
            in_specs=[
                pl.BlockSpec((None, bt, ti), lambda bb, jj, gg: (gg, bb, 0)),   # cr_blk
                pl.BlockSpec((None, bt, ti), lambda bb, jj, gg: (gg, bb, 0)),   # ci_blk
                pl.BlockSpec((bt, n_in_p), lambda bb, jj, gg: (bb, 0)),         # a
                pl.BlockSpec((bt, n_in_p), lambda bb, jj, gg: (bb, 0)),         # b
                w_spec,                                                          # W (bf16)
            ],
            out_specs=pl.BlockSpec((bt, tn), lambda bb, jj, gg: (bb, jj)),
            scratch_shapes=[pltpu.VMEM((bt, k_blk), jnp.bfloat16)],              # LHS scratch
        ),
        compiler_params=pltpu.CompilerParams(
            # The K-reduction axis MUST stay "arbitrary" (sequential) and last:
            # the f32 output block accumulates in VMEM across it.
            dimension_semantics=("parallel", "parallel", "arbitrary"),
            vmem_limit_bytes=vmem_limit,
        ),
    )(cr_blk, ci_blk, a, b, w4)

    out_r = out[:B, :n_out]
    out_i = out[B:2 * B, :n_out]
    return jnp.stack([out_r, out_i], axis=-1)     # (B, n_out, 2)


# -----------------------------------------------------------------------------
# Module-equivalent setup (the __init__ precompute), numpy glue.
# -----------------------------------------------------------------------------
class CGwoFilterPallas:
    def __init__(self, lmax, taus, lll_mode=None):
        self.lmax = lmax
        self.t_F = np.asarray(taus, dtype=np.int64)
        self.cum_taus = np.concatenate(
            [[0], (self.t_F * (1 + 2 * np.arange(lmax + 1))).cumsum()])

        if lll_mode is None:
            # default (CGNet paper) l-tuples: all l1 <= l2 with |l1-l2| <= l <= l1+l2
            ltuples = []
            for l in range(lmax + 1):
                tl = []
                for l1 in range(lmax + 1):
                    for l2 in range(l1, lmax + 1):
                        if abs(l1 - l2) <= l <= l1 + l2:
                            tl.append((l1, l2))
                ltuples.append(sorted(tl))
        else:
            ltuples = [sorted(t) for t in lll_mode]
        self.ltuples = ltuples

        # new taus and per-tuple channel offsets (cal_new_tau_and_offsets)
        self.t_FF = np.zeros(lmax + 1, dtype=np.int64)
        self.t_offsets = []
        for l in range(lmax + 1):
            off, offs_l = 0, []
            for (l1, l2) in ltuples[l]:
                offs_l.append(off)
                off += int(self.t_F[l1] * self.t_F[l2])
            self.t_FF[l] = off
            self.t_offsets.append(offs_l)
        self.cumu_tm_FF = np.concatenate(
            [[0], (self.t_FF * (1 + 2 * np.arange(lmax + 1))).cumsum()])
        self.n_in = int(self.cum_taus[-1])
        self.n_out = int(self.cumu_tm_FF[-1])

        # Dense bilinear CG map W[o, i, j] (replaces CG_cuda_ops.sparse_precomputeCG).
        # TODO(synk): for production CGNet sizes replace this dense tensor with
        # block-sparse per-(l,l1,l2) matmuls driven by scalar-prefetched offsets;
        # the dense form is O(n_out*n_in^2) and >99% zeros from CG selection rules.
        W = np.zeros((self.n_out, self.n_in, self.n_in), dtype=np.float64)
        for l in range(lmax + 1):
            for tidx, (l1, l2) in enumerate(ltuples[l]):
                t_off = self.t_offsets[l][tidx]
                tau1, tau2 = int(self.t_F[l1]), int(self.t_F[l2])
                for m in range(-l, l + 1):
                    for m1 in range(-l1, l1 + 1):
                        m2 = m - m1
                        if abs(m2) > l2:
                            continue
                        c = clebsch_gordan(l1, m1, l2, m2, l, m)
                        if c == 0.0:
                            continue
                        for t1 in range(tau1):
                            for t2 in range(tau2):
                                i_idx = self.cum_taus[l1] + (m1 + l1) * tau1 + t1
                                j_idx = self.cum_taus[l2] + (m2 + l2) * tau2 + t2
                                tt = t_off + t1 * tau2 + t2
                                o_idx = self.cumu_tm_FF[l] + (m + l) * self.t_FF[l] + tt
                                W[o_idx, i_idx, j_idx] += c
        self.W_oij = W  # float64, unpadded (kept for the reference check)

        # Padded, transposed, K-flattened weights for the TPU kernel:
        #   n_in  -> multiple of 16  (so a divisor ti of n_in_p gives ti*n_in_p % 128 == 0)
        #   n_out -> multiple of 128 (lane-dense, unmasked stores on the output)
        self.n_in_p = _round_up(self.n_in, 16)
        self.n_out_p = _round_up(self.n_out, 128)
        Wt = np.zeros((self.n_in_p, self.n_in_p, self.n_out_p), dtype=np.float32)
        Wt[: self.n_in, : self.n_in, : self.n_out] = np.transpose(W, (1, 2, 0))
        # bf16 weights: MXU-native; halves the W HBM/VMEM footprint.
        # TODO(synk): keep W in f32 (f32 MXU passes) if equivariance-sensitive use
        # needs the extra ~8 mantissa bits — W bandwidth is no longer the bottleneck.
        self.W_flat = jnp.asarray(
            Wt.reshape(self.n_in_p * self.n_in_p, self.n_out_p), dtype=jnp.bfloat16)

    def forward(self, activations, straight_output=True):
        if isinstance(activations, (list, tuple)):
            bsz = activations[0].shape[0]
            activations = jnp.concatenate(
                [jnp.reshape(v, (bsz, -1, 2)) for v in activations], axis=1)
        out = cg_forward_pallas(activations, self.W_flat, self.n_in, self.n_in_p,
                                self.n_out, self.n_out_p)
        # TODO(synk): straight_output=False (CGutils.reshape_out list output) is pure
        # host-side glue and omitted; straight cumu_tm_FF layout matches the CUDA op.
        return out


# -----------------------------------------------------------------------------
# main
# -----------------------------------------------------------------------------
if __name__ == "__main__":
    lmax = 2
    taus = [2, 2, 2]        # l-fragment l has shape (2l+1, taus[l], 2)
    batch = 4

    mod = CGwoFilterPallas(lmax, taus, lll_mode=None)

    key = jax.random.PRNGKey(0)
    x = jax.random.normal(key, (batch, mod.n_in, 2), dtype=jnp.float32)

    fwd = jax.jit(lambda a: mod.forward(a))
    out = jax.block_until_ready(fwd(x))
    assert out.shape == (batch, mod.n_out, 2), out.shape

    # Reference 1: exact complex bilinear CG product in float64.
    xn = np.asarray(x, dtype=np.float64)
    xc = xn[..., 0] + 1j * xn[..., 1]
    ref_c = np.einsum("oij,bi,bj->bo", mod.W_oij, xc, xc)
    ref64 = np.stack([ref_c.real, ref_c.imag], axis=-1)

    # Reference 2: emulate the kernel's bf16 numerics (bf16 operands, bf16
    # elementwise products/sums, bf16 W, f32 accumulation in the matmul).
    def _bf(arr):
        return np.asarray(
            jnp.asarray(np.asarray(arr, np.float32), jnp.bfloat16).astype(jnp.float32))

    xr_b = _bf(xn[..., 0])
    xi_b = _bf(xn[..., 1])
    t_rr = _bf(np.einsum("bi,bj->bij", xr_b, xr_b))
    t_ii = _bf(np.einsum("bi,bj->bij", xi_b, -xi_b))
    p_r = _bf(t_rr + t_ii)
    t_ri = _bf(np.einsum("bi,bj->bij", xr_b, xi_b))
    t_ir = _bf(np.einsum("bi,bj->bij", xi_b, xr_b))
    p_i = _bf(t_ri + t_ir)
    w_bf = _bf(mod.W_oij)
    ref_bf = np.stack(
        [np.einsum("bij,oij->bo", p_r, w_bf),
         np.einsum("bij,oij->bo", p_i, w_bf)], axis=-1)

    got = np.asarray(out, dtype=np.float64)
    # Kernel plumbing check (matches the bf16 numerics of the kernel).
    np.testing.assert_allclose(got, ref_bf, rtol=2e-2, atol=2e-2)
    # bf16-adequacy sanity check against the exact result.
    np.testing.assert_allclose(got, ref64, rtol=1e-1, atol=1e-1)
    print("KERNEL_OK")
</pallas_src>

<mosaic_0001>
module attributes {stable_mosaic.version = 11 : i64} {
  func.func @kernel(%arg0: i32, %arg1: i32, %arg2: i32, %arg3: memref<1x16x32xbf16, #tpu.memory_space<vmem>>, %arg4: memref<1x16x32xbf16, #tpu.memory_space<vmem>>, %arg5: memref<16x32xbf16, #tpu.memory_space<vmem>>, %arg6: memref<16x32xbf16, #tpu.memory_space<vmem>>, %arg7: memref<2x1x1024x128xbf16, #tpu.memory_space<vmem>>, %arg8: memref<16x128xf32, #tpu.memory_space<vmem>>, %arg9: memref<16x1024xbf16, #tpu.memory_space<vmem>>) attributes {dimension_semantics = [#tpu.dimension_semantics<parallel>, #tpu.dimension_semantics<parallel>, #tpu.dimension_semantics<arbitrary>], iteration_bounds = array<i64: 1, 2, 1>, scalar_prefetch = 0 : i64, scratch_operands = 1 : i64, tpu.core_type = #tpu.core_type<tc>, window_params = [{transform_indices = @transform_0, window_bounds = array<i64: 1, 16, 32>}, {transform_indices = @transform_1, window_bounds = array<i64: 1, 16, 32>}, {transform_indices = @transform_2, window_bounds = array<i64: 16, 32>}, {transform_indices = @transform_3, window_bounds = array<i64: 16, 32>}, {pipeline_mode = #tpu.pipeline_mode<synchronous>, transform_indices = @transform_4, window_bounds = array<i64: 2, 1, 1024, 128>}, {transform_indices = @transform_5, window_bounds = array<i64: 16, 128>}]} {
    %c0_i32 = arith.constant 0 : i32
    %0 = arith.cmpi eq, %arg2, %c0_i32 : i32
    %1 = arith.extui %0 : i1 to i32
    %c0_i32_0 = arith.constant 0 : i32
    %2 = arith.cmpi ne, %1, %c0_i32_0 : i32
    scf.if %2 {
      %cst_206 = arith.constant 0.000000e+00 : f32
      %334 = vector.broadcast %cst_206 : f32 to vector<16x128xf32>
      %c0_207 = arith.constant 0 : index
      %c0_208 = arith.constant 0 : index
      %335 = vector.load %arg8[%c0_207, %c0_208] : memref<16x128xf32, #tpu.memory_space<vmem>>, vector<16x128xf32>
      tpu.vector_store %arg8[%c0_207, %c0_208], %334 {strides = array<i32>} : memref<16x128xf32, #tpu.memory_space<vmem>>, vector<16x128xf32>,
    } else {
    }
    %c0 = arith.constant 0 : index
    %c0_1 = arith.constant 0 : index
    %3 = vector.load %arg5[%c0, %c0_1] : memref<16x32xbf16, #tpu.memory_space<vmem>>, vector<16x32xbf16>
    %c0_2 = arith.constant 0 : index
    %c0_3 = arith.constant 0 : index
    %4 = vector.load %arg6[%c0_2, %c0_3] : memref<16x32xbf16, #tpu.memory_space<vmem>>, vector<16x32xbf16>
    %c0_4 = arith.constant 0 : index
    %c0_5 = arith.constant 0 : index
    %c0_6 = arith.constant 0 : index
    %5 = vector.load %arg3[%c0_4, %c0_5, %c0_6] : memref<1x16x32xbf16, #tpu.memory_space<vmem>>, vector<1x16x1xbf16>
    %6 = vector.shape_cast %5 : vector<1x16x1xbf16> to vector<16x1xbf16>
    %7 = vector.broadcast %6 : vector<16x1xbf16> to vector<16x32xbf16>
    %8 = arith.mulf %7, %3 : vector<16x32xbf16>
    %c0_7 = arith.constant 0 : index
    %c0_8 = arith.constant 0 : index
    %c0_9 = arith.constant 0 : index
    %9 = vector.load %arg4[%c0_7, %c0_8, %c0_9] : memref<1x16x32xbf16, #tpu.memory_space<vmem>>, vector<1x16x1xbf16>
    %10 = vector.shape_cast %9 : vector<1x16x1xbf16> to vector<16x1xbf16>
    %11 = vector.broadcast %10 : vector<16x1xbf16> to vector<16x32xbf16>
    %12 = arith.mulf %11, %4 : vector<16x32xbf16>
    %13 = arith.addf %8, %12 : vector<16x32xbf16>
    %c0_10 = arith.constant 0 : index
    %c0_11 = arith.constant 0 : index
    %14 = vector.load %arg9[%c0_10, %c0_11] : memref<16x1024xbf16, #tpu.memory_space<vmem>>, vector<16x32xbf16>
    tpu.vector_store %arg9[%c0_10, %c0_11], %13 {strides = array<i32>} : memref<16x1024xbf16, #tpu.memory_space<vmem>>, vector<16x32xbf16>,
    %c0_12 = arith.constant 0 : index
    %c0_13 = arith.constant 0 : index
    %c1 = arith.constant 1 : index
    %15 = vector.load %arg3[%c0_12, %c0_13, %c1] : memref<1x16x32xbf16, #tpu.memory_space<vmem>>, vector<1x16x1xbf16>
    %16 = vector.shape_cast %15 : vector<1x16x1xbf16> to vector<16x1xbf16>
    %17 = vector.broadcast %16 : vector<16x1xbf16> to vector<16x32xbf16>
    %18 = arith.mulf %17, %3 : vector<16x32xbf16>
    %c0_14 = arith.constant 0 : index
    %c0_15 = arith.constant 0 : index
    %c1_16 = arith.constant 1 : index
    %19 = vector.load %arg4[%c0_14, %c0_15, %c1_16] : memref<1x16x32xbf16, #tpu.memory_space<vmem>>, vector<1x16x1xbf16>
    %20 = vector.shape_cast %19 : vector<1x16x1xbf16> to vector<16x1xbf16>
    %21 = vector.broadcast %20 : vector<16x1xbf16> to vector<16x32xbf16>
    %22 = arith.mulf %21, %4 : vector<16x32xbf16>
    %23 = arith.addf %18, %22 : vector<16x32xbf16>
    %c0_17 = arith.constant 0 : index
    %c32 = arith.constant 32 : index
    %24 = vector.load %arg9[%c0_17, %c32] : memref<16x1024xbf16, #tpu.memory_space<vmem>>, vector<16x32xbf16>
    tpu.vector_store %arg9[%c0_17, %c32], %23 {strides = array<i32>} : memref<16x1024xbf16, #tpu.memory_space<vmem>>, vector<16x32xbf16>,
    %c0_18 = arith.constant 0 : index
    %c0_19 = arith.constant 0 : index
    %c2 = arith.constant 2 : index
    %25 = vector.load %arg3[%c0_18, %c0_19, %c2] : memref<1x16x32xbf16, #tpu.memory_space<vmem>>, vector<1x16x1xbf16>
    %26 = vector.shape_cast %25 : vector<1x16x1xbf16> to vector<16x1xbf16>
    %27 = vector.broadcast %26 : vector<16x1xbf16> to vector<16x32xbf16>
    %28 = arith.mulf %27, %3 : vector<16x32xbf16>
    %c0_20 = arith.constant 0 : index
    %c0_21 = arith.constant 0 : index
    %c2_22 = arith.constant 2 : index
    %29 = vector.load %arg4[%c0_20, %c0_21, %c2_22] : memref<1x16x32xbf16, #tpu.memory_space<vmem>>, vector<1x16x1xbf16>
    %30 = vector.shape_cast %29 : vector<1x16x1xbf16> to vector<16x1xbf16>
    %31 = vector.broadcast %30 : vector<16x1xbf16> to vector<16x32xbf16>
    %32 = arith.mulf %31, %4 : vector<16x32xbf16>
    %33 = arith.addf %28, %32 : vector<16x32xbf16>
    %c0_23 = arith.constant 0 : index
    %c64 = arith.constant 64 : index
    %34 = vector.load %arg9[%c0_23, %c64] : memref<16x1024xbf16, #tpu.memory_space<vmem>>, vector<16x32xbf16>
    tpu.vector_store %arg9[%c0_23, %c64], %33 {strides = array<i32>} : memref<16x1024xbf16, #tpu.memory_space<vmem>>, vector<16x32xbf16>,
    %c0_24 = arith.constant 0 : index
    %c0_25 = arith.constant 0 : index
    %c3 = arith.constant 3 : index
    %35 = vector.load %arg3[%c0_24, %c0_25, %c3] : memref<1x16x32xbf16, #tpu.memory_space<vmem>>, vector<1x16x1xbf16>
    %36 = vector.shape_cast %35 : vector<1x16x1xbf16> to vector<16x1xbf16>
    %37 = vector.broadcast %36 : vector<16x1xbf16> to vector<16x32xbf16>
    %38 = arith.mulf %37, %3 : vector<16x32xbf16>
    %c0_26 = arith.constant 0 : index
    %c0_27 = arith.constant 0 : index
    %c3_28 = arith.constant 3 : index
    %39 = vector.load %arg4[%c0_26, %c0_27, %c3_28] : memref<1x16x32xbf16, #tpu.memory_space<vmem>>, vector<1x16x1xbf16>
    %40 = vector.shape_cast %39 : vector<1x16x1xbf16> to vector<16x1xbf16>
    %41 = vector.broadcast %40 : vector<16x1xbf16> to vector<16x32xbf16>
    %42 = arith.mulf %41, %4 : vector<16x32xbf16>
    %43 = arith.addf %38, %42 : vector<16x32xbf16>
    %c0_29 = arith.constant 0 : index
    %c96 = arith.constant 96 : index
    %44 = vector.load %arg9[%c0_29, %c96] : memref<16x1024xbf16, #tpu.memory_space<vmem>>, vector<16x32xbf16>
    tpu.vector_store %arg9[%c0_29, %c96], %43 {strides = array<i32>} : memref<16x1024xbf16, #tpu.memory_space<vmem>>, vector<16x32xbf16>,
    %c0_30 = arith.constant 0 : index
    %c0_31 = arith.constant 0 : index
    %c4 = arith.constant 4 : index
    %45 = vector.load %arg3[%c0_30, %c0_31, %c4] : memref<1x16x32xbf16, #tpu.memory_space<vmem>>, vector<1x16x1xbf16>
    %46 = vector.shape_cast %45 : vector<1x16x1xbf16> to vector<16x1xbf16>
    %47 = vector.broadcast %46 : vector<16x1xbf16> to vector<16x32xbf16>
    %48 = arith.mulf %47, %3 : vector<16x32xbf16>
    %c0_32 = arith.constant 0 : index
    %c0_33 = arith.constant 0 : index
    %c4_34 = arith.constant 4 : index
    %49 = vector.load %arg4[%c0_32, %c0_33, %c4_34] : memref<1x16x32xbf16, #tpu.memory_space<vmem>>, vector<1x16x1xbf16>
    %50 = vector.shape_cast %49 : vector<1x16x1xbf16> to vector<16x1xbf16>
    %51 = vector.broadcast %50 : vector<16x1xbf16> to vector<16x32xbf16>
    %52 = arith.mulf %51, %4 : vector<16x32xbf16>
    %53 = arith.addf %48, %52 : vector<16x32xbf16>
    %c0_35 = arith.constant 0 : index
    %c128 = arith.constant 128 : index
    %54 = vector.load %arg9[%c0_35, %c128] : memref<16x1024xbf16, #tpu.memory_space<vmem>>, vector<16x32xbf16>
    tpu.vector_store %arg9[%c0_35, %c128], %53 {strides = array<i32>} : memref<16x1024xbf16, #tpu.memory_space<vmem>>, vector<16x32xbf16>,
    %c0_36 = arith.constant 0 : index
    %c0_37 = arith.constant 0 : index
    %c5 = arith.constant 5 : index
    %55 = vector.load %arg3[%c0_36, %c0_37, %c5] : memref<1x16x32xbf16, #tpu.memory_space<vmem>>, vector<1x16x1xbf16>
    %56 = vector.shape_cast %55 : vector<1x16x1xbf16> to vector<16x1xbf16>
    %57 = vector.broadcast %56 : vector<16x1xbf16> to vector<16x32xbf16>
    %58 = arith.mulf %57, %3 : vector<16x32xbf16>
    %c0_38 = arith.constant 0 : index
    %c0_39 = arith.constant 0 : index
    %c5_40 = arith.constant 5 : index
    %59 = vector.load %arg4[%c0_38, %c0_39, %c5_40] : memref<1x16x32xbf16, #tpu.memory_space<vmem>>, vector<1x16x1xbf16>
    %60 = vector.shape_cast %59 : vector<1x16x1xbf16> to vector<16x1xbf16>
    %61 = vector.broadcast %60 : vector<16x1xbf16> to vector<16x32xbf16>
    %62 = arith.mulf %61, %4 : vector<16x32xbf16>
    %63 = arith.addf %58, %62 : vector<16x32xbf16>
    %c0_41 = arith.constant 0 : index
    %c160 = arith.constant 160 : index
    %64 = vector.load %arg9[%c0_41, %c160] : memref<16x1024xbf16, #tpu.memory_space<vmem>>, vector<16x32xbf16>
    tpu.vector_store %arg9[%c0_41, %c160], %63 {strides = array<i32>} : memref<16x1024xbf16, #tpu.memory_space<vmem>>, vector<16x32xbf16>,
    %c0_42 = arith.constant 0 : index
    %c0_43 = arith.constant 0 : index
    %c6 = arith.constant 6 : index
    %65 = vector.load %arg3[%c0_42, %c0_43, %c6] : memref<1x16x32xbf16, #tpu.memory_space<vmem>>, vector<1x16x1xbf16>
    %66 = vector.shape_cast %65 : vector<1x16x1xbf16> to vector<16x1xbf16>
    %67 = vector.broadcast %66 : vector<16x1xbf16> to vector<16x32xbf16>
    %68 = arith.mulf %67, %3 : vector<16x32xbf16>
    %c0_44 = arith.constant 0 : index
    %c0_45 = arith.constant 0 : index
    %c6_46 = arith.constant 6 : index
    %69 = vector.load %arg4[%c0_44, %c0_45, %c6_46] : memref<1x16x32xbf16, #tpu.memory_space<vmem>>, vector<1x16x1xbf16>
    %70 = vector.shape_cast %69 : vector<1x16x1xbf16> to vector<16x1xbf16>
    %71 = vector.broadcast %70 : vector<16x1xbf16> to vector<16x32xbf16>
    %72 = arith.mulf %71, %4 : vector<16x32xbf16>
    %73 = arith.addf %68, %72 : vector<16x32xbf16>
    %c0_47 = arith.constant 0 : index
    %c192 = arith.constant 192 : index
    %74 = vector.load %arg9[%c0_47, %c192] : memref<16x1024xbf16, #tpu.memory_space<vmem>>, vector<16x32xbf16>
    tpu.vector_store %arg9[%c0_47, %c192], %73 {strides = array<i32>} : memref<16x1024xbf16, #tpu.memory_space<vmem>>, vector<16x32xbf16>,
    %c0_48 = arith.constant 0 : index
    %c0_49 = arith.constant 0 : index
    %c7 = arith.constant 7 : index
    %75 = vector.load %arg3[%c0_48, %c0_49, %c7] : memref<1x16x32xbf16, #tpu.memory_space<vmem>>, vector<1x16x1xbf16>
    %76 = vector.shape_cast %75 : vector<1x16x1xbf16> to vector<16x1xbf16>
    %77 = vector.broadcast %76 : vector<16x1xbf16> to vector<16x32xbf16>
    %78 = arith.mulf %77, %3 : vector<16x32xbf16>
    %c0_50 = arith.constant 0 : index
    %c0_51 = arith.constant 0 : index
    %c7_52 = arith.constant 7 : index
    %79 = vector.load %arg4[%c0_50, %c0_51, %c7_52] : memref<1x16x32xbf16, #tpu.memory_space<vmem>>, vector<1x16x1xbf16>
    %80 = vector.shape_cast %79 : vector<1x16x1xbf16> to vector<16x1xbf16>
    %81 = vector.broadcast %80 : vector<16x1xbf16> to vector<16x32xbf16>
    %82 = arith.mulf %81, %4 : vector<16x32xbf16>
    %83 = arith.addf %78, %82 : vector<16x32xbf16>
    %c0_53 = arith.constant 0 : index
    %c224 = arith.constant 224 : index
    %84 = vector.load %arg9[%c0_53, %c224] : memref<16x1024xbf16, #tpu.memory_space<vmem>>, vector<16x32xbf16>
    tpu.vector_store %arg9[%c0_53, %c224], %83 {strides = array<i32>} : memref<16x1024xbf16, #tpu.memory_space<vmem>>, vector<16x32xbf16>,
    %c0_54 = arith.constant 0 : index
    %c0_55 = arith.constant 0 : index
    %c8 = arith.constant 8 : index
    %85 = vector.load %arg3[%c0_54, %c0_55, %c8] : memref<1x16x32xbf16, #tpu.memory_space<vmem>>, vector<1x16x1xbf16>
    %86 = vector.shape_cast %85 : vector<1x16x1xbf16> to vector<16x1xbf16>
    %87 = vector.broadcast %86 : vector<16x1xbf16> to vector<16x32xbf16>
    %88 = arith.mulf %87, %3 : vector<16x32xbf16>
    %c0_56 = arith.constant 0 : index
    %c0_57 = arith.constant 0 : index
    %c8_58 = arith.constant 8 : index
    %89 = vector.load %arg4[%c0_56, %c0_57, %c8_58] : memref<1x16x32xbf16, #tpu.memory_space<vmem>>, vector<1x16x1xbf16>
    %90 = vector.shape_cast %89 : vector<1x16x1xbf16> to vector<16x1xbf16>
    %91 = vector.broadcast %90 : vector<16x1xbf16> to vector<16x32xbf16>
    %92 = arith.mulf %91, %4 : vector<16x32xbf16>
    %93 = arith.addf %88, %92 : vector<16x32xbf16>
    %c0_59 = arith.constant 0 : index
    %c256 = arith.constant 256 : index
    %94 = vector.load %arg9[%c0_59, %c256] : memref<16x1024xbf16, #tpu.memory_space<vmem>>, vector<16x32xbf16>
    tpu.vector_store %arg9[%c0_59, %c256], %93 {strides = array<i32>} : memref<16x1024xbf16, #tpu.memory_space<vmem>>, vector<16x32xbf16>,
    %c0_60 = arith.constant 0 : index
    %c0_61 = arith.constant 0 : index
    %c9 = arith.constant 9 : index
    %95 = vector.load %arg3[%c0_60, %c0_61, %c9] : memref<1x16x32xbf16, #tpu.memory_space<vmem>>, vector<1x16x1xbf16>
    %96 = vector.shape_cast %95 : vector<1x16x1xbf16> to vector<16x1xbf16>
    %97 = vector.broadcast %96 : vector<16x1xbf16> to vector<16x32xbf16>
    %98 = arith.mulf %97, %3 : vector<16x32xbf16>
    %c0_62 = arith.constant 0 : index
    %c0_63 = arith.constant 0 : index
    %c9_64 = arith.constant 9 : index
    %99 = vector.load %arg4[%c0_62, %c0_63, %c9_64] : memref<1x16x32xbf16, #tpu.memory_space<vmem>>, vector<1x16x1xbf16>
    %100 = vector.shape_cast %99 : vector<1x16x1xbf16> to vector<16x1xbf16>
    %101 = vector.broadcast %100 : vector<16x1xbf16> to vector<16x32xbf16>
    %102 = arith.mulf %101, %4 : vector<16x32xbf16>
    %103 = arith.addf %98, %102 : vector<16x32xbf16>
    %c0_65 = arith.constant 0 : index
    %c288 = arith.constant 288 : index
    %104 = vector.load %arg9[%c0_65, %c288] : memref<16x1024xbf16, #tpu.memory_space<vmem>>, vector<16x32xbf16>
    tpu.vector_store %arg9[%c0_65, %c288], %103 {strides = array<i32>} : memref<16x1024xbf16, #tpu.memory_space<vmem>>, vector<16x32xbf16>,
    %c0_66 = arith.constant 0 : index
    %c0_67 = arith.constant 0 : index
    %c10 = arith.constant 10 : index
    %105 = vector.load %arg3[%c0_66, %c0_67, %c10] : memref<1x16x32xbf16, #tpu.memory_space<vmem>>, vector<1x16x1xbf16>
    %106 = vector.shape_cast %105 : vector<1x16x1xbf16> to vector<16x1xbf16>
    %107 = vector.broadcast %106 : vector<16x1xbf16> to vector<16x32xbf16>
    %108 = arith.mulf %107, %3 : vector<16x32xbf16>
    %c0_68 = arith.constant 0 : index
    %c0_69 = arith.constant 0 : index
    %c10_70 = arith.constant 10 : index
    %109 = vector.load %arg4[%c0_68, %c0_69, %c10_70] : memref<1x16x32xbf16, #tpu.memory_space<vmem>>, vector<1x16x1xbf16>
    %110 = vector.shape_cast %109 : vector<1x16x1xbf16> to vector<16x1xbf16>
    %111 = vector.broadcast %110 : vector<16x1xbf16> to vector<16x32xbf16>
    %112 = arith.mulf %111, %4 : vector<16x32xbf16>
    %113 = arith.addf %108, %112 : vector<16x32xbf16>
    %c0_71 = arith.constant 0 : index
    %c320 = arith.constant 320 : index
    %114 = vector.load %arg9[%c0_71, %c320] : memref<16x1024xbf16, #tpu.memory_space<vmem>>, vector<16x32xbf16>
    tpu.vector_store %arg9[%c0_71, %c320], %113 {strides = array<i32>} : memref<16x1024xbf16, #tpu.memory_space<vmem>>, vector<16x32xbf16>,
    %c0_72 = arith.constant 0 : index
    %c0_73 = arith.constant 0 : index
    %c11 = arith.constant 11 : index
    %115 = vector.load %arg3[%c0_72, %c0_73, %c11] : memref<1x16x32xbf16, #tpu.memory_space<vmem>>, vector<1x16x1xbf16>
    %116 = vector.shape_cast %115 : vector<1x16x1xbf16> to vector<16x1xbf16>
    %117 = vector.broadcast %116 : vector<16x1xbf16> to vector<16x32xbf16>
    %118 = arith.mulf %117, %3 : vector<16x32xbf16>
    %c0_74 = arith.constant 0 : index
    %c0_75 = arith.constant 0 : index
    %c11_76 = arith.constant 11 : index
    %119 = vector.load %arg4[%c0_74, %c0_75, %c11_76] : memref<1x16x32xbf16, #tpu.memory_space<vmem>>, vector<1x16x1xbf16>
    %120 = vector.shape_cast %119 : vector<1x16x1xbf16> to vector<16x1xbf16>
    %121 = vector.broadcast %120 : vector<16x1xbf16> to vector<16x32xbf16>
    %122 = arith.mulf %121, %4 : vector<16x32xbf16>
    %123 = arith.addf %118, %122 : vector<16x32xbf16>
    %c0_77 = arith.constant 0 : index
    %c352 = arith.constant 352 : index
    %124 = vector.load %arg9[%c0_77, %c352] : memref<16x1024xbf16, #tpu.memory_space<vmem>>, vector<16x32xbf16>
    tpu.vector_store %arg9[%c0_77, %c352], %123 {strides = array<i32>} : memref<16x1024xbf16, #tpu.memory_space<vmem>>, vector<16x32xbf16>,
    %c0_78 = arith.constant 0 : index
    %c0_79 = arith.constant 0 : index
    %c12 = arith.constant 12 : index
    %125 = vector.load %arg3[%c0_78, %c0_79, %c12] : memref<1x16x32xbf16, #tpu.memory_space<vmem>>, vector<1x16x1xbf16>
    %126 = vector.shape_cast %125 : vector<1x16x1xbf16> to vector<16x1xbf16>
    %127 = vector.broadcast %126 : vector<16x1xbf16> to vector<16x32xbf16>
    %128 = arith.mulf %127, %3 : vector<16x32xbf16>
    %c0_80 = arith.constant 0 : index
    %c0_81 = arith.constant 0 : index
    %c12_82 = arith.constant 12 : index
    %129 = vector.load %arg4[%c0_80, %c0_81, %c12_82] : memref<1x16x32xbf16, #tpu.memory_space<vmem>>, vector<1x16x1xbf16>
    %130 = vector.shape_cast %129 : vector<1x16x1xbf16> to vector<16x1xbf16>
    %131 = vector.broadcast %130 : vector<16x1xbf16> to vector<16x32xbf16>
    %132 = arith.mulf %131, %4 : vector<16x32xbf16>
    %133 = arith.addf %128, %132 : vector<16x32xbf16>
    %c0_83 = arith.constant 0 : index
    %c384 = arith.constant 384 : index
    %134 = vector.load %arg9[%c0_83, %c384] : memref<16x1024xbf16, #tpu.memory_space<vmem>>, vector<16x32xbf16>
    tpu.vector_store %arg9[%c0_83, %c384], %133 {strides = array<i32>} : memref<16x1024xbf16, #tpu.memory_space<vmem>>, vector<16x32xbf16>,
    %c0_84 = arith.constant 0 : index
    %c0_85 = arith.constant 0 : index
    %c13 = arith.constant 13 : index
    %135 = vector.load %arg3[%c0_84, %c0_85, %c13] : memref<1x16x32xbf16, #tpu.memory_space<vmem>>, vector<1x16x1xbf16>
    %136 = vector.shape_cast %135 : vector<1x16x1xbf16> to vector<16x1xbf16>
    %137 = vector.broadcast %136 : vector<16x1xbf16> to vector<16x32xbf16>
    %138 = arith.mulf %137, %3 : vector<16x32xbf16>
    %c0_86 = arith.constant 0 : index
    %c0_87 = arith.constant 0 : index
    %c13_88 = arith.constant 13 : index
    %139 = vector.load %arg4[%c0_86, %c0_87, %c13_88] : memref<1x16x32xbf16, #tpu.memory_space<vmem>>, vector<1x16x1xbf16>
    %140 = vector.shape_cast %139 : vector<1x16x1xbf16> to vector<16x1xbf16>
    %141 = vector.broadcast %140 : vector<16x1xbf16> to vector<16x32xbf16>
    %142 = arith.mulf %141, %4 : vector<16x32xbf16>
    %143 = arith.addf %138, %142 : vector<16x32xbf16>
    %c0_89 = arith.constant 0 : index
    %c416 = arith.constant 416 : index
    %144 = vector.load %arg9[%c0_89, %c416] : memref<16x1024xbf16, #tpu.memory_space<vmem>>, vector<16x32xbf16>
    tpu.vector_store %arg9[%c0_89, %c416], %143 {strides = array<i32>} : memref<16x1024xbf16, #tpu.memory_space<vmem>>, vector<16x32xbf16>,
    %c0_90 = arith.constant 0 : index
    %c0_91 = arith.constant 0 : index
    %c14 = arith.constant 14 : index
    %145 = vector.load %arg3[%c0_90, %c0_91, %c14] : memref<1x16x32xbf16, #tpu.memory_space<vmem>>, vector<1x16x1xbf16>
    %146 = vector.shape_cast %145 : vector<1x16x1xbf16> to vector<16x1xbf16>
    %147 = vector.broadcast %146 : vector<16x1xbf16> to vector<16x32xbf16>
    %148 = arith.mulf %147, %3 : vector<16x32xbf16>
    %c0_92 = arith.constant 0 : index
    %c0_93 = arith.constant 0 : index
    %c14_94 = arith.constant 14 : index
    %149 = vector.load %arg4[%c0_92, %c0_93, %c14_94] : memref<1x16x32xbf16, #tpu.memory_space<vmem>>, vector<1x16x1xbf16>
    %150 = vector.shape_cast %149 : vector<1x16x1xbf16> to vector<16x1xbf16>
    %151 = vector.broadcast %150 : vector<16x1xbf16> to vector<16x32xbf16>
    %152 = arith.mulf %151, %4 : vector<16x32xbf16>
    %153 = arith.addf %148, %152 : vector<16x32xbf16>
    %c0_95 = arith.constant 0 : index
    %c448 = arith.constant 448 : index
    %154 = vector.load %arg9[%c0_95, %c448] : memref<16x1024xbf16, #tpu.memory_space<vmem>>, vector<16x32xbf16>
    tpu.vector_store %arg9[%c0_95, %c448], %153 {strides = array<i32>} : memref<16x1024xbf16, #tpu.memory_space<vmem>>, vector<16x32xbf16>,
    %c0_96 = arith.constant 0 : index
    %c0_97 = arith.constant 0 : index
    %c15 = arith.constant 15 : index
    %155 = vector.load %arg3[%c0_96, %c0_97, %c15] : memref<1x16x32xbf16, #tpu.memory_space<vmem>>, vector<1x16x1xbf16>
    %156 = vector.shape_cast %155 : vector<1x16x1xbf16> to vector<16x1xbf16>
    %157 = vector.broadcast %156 : vector<16x1xbf16> to vector<16x32xbf16>
    %158 = arith.mulf %157, %3 : vector<16x32xbf16>
    %c0_98 = arith.constant 0 : index
    %c0_99 = arith.constant 0 : index
    %c15_100 = arith.constant 15 : index
    %159 = vector.load %arg4[%c0_98, %c0_99, %c15_100] : memref<1x16x32xbf16, #tpu.memory_space<vmem>>, vector<1x16x1xbf16>
    %160 = vector.shape_cast %159 : vector<1x16x1xbf16> to vector<16x1xbf16>
    %161 = vector.broadcast %160 : vector<16x1xbf16> to vector<16x32xbf16>
    %162 = arith.mulf %161, %4 : vector<16x32xbf16>
    %163 = arith.addf %158, %162 : vector<16x32xbf16>
    %c0_101 = arith.constant 0 : index
    %c480 = arith.constant 480 : index
    %164 = vector.load %arg9[%c0_101, %c480] : memref<16x1024xbf16, #tpu.memory_space<vmem>>, vector<16x32xbf16>
    tpu.vector_store %arg9[%c0_101, %c480], %163 {strides = array<i32>} : memref<16x1024xbf16, #tpu.memory_space<vmem>>, vector<16x32xbf16>,
    %c0_102 = arith.constant 0 : index
    %c0_103 = arith.constant 0 : index
    %c16 = arith.constant 16 : index
    %165 = vector.load %arg3[%c0_102, %c0_103, %c16] : memref<1x16x32xbf16, #tpu.memory_space<vmem>>, vector<1x16x1xbf16>
    %166 = vector.shape_cast %165 : vector<1x16x1xbf16> to vector<16x1xbf16>
    %167 = vector.broadcast %166 : vector<16x1xbf16> to vector<16x32xbf16>
    %168 = arith.mulf %167, %3 : vector<16x32xbf16>
    %c0_104 = arith.constant 0 : index
    %c0_105 = arith.constant 0 : index
    %c16_106 = arith.constant 16 : index
    %169 = vector.load %arg4[%c0_104, %c0_105, %c16_106] : memref<1x16x32xbf16, #tpu.memory_space<vmem>>, vector<1x16x1xbf16>
    %170 = vector.shape_cast %169 : vector<1x16x1xbf16> to vector<16x1xbf16>
    %171 = vector.broadcast %170 : vector<16x1xbf16> to vector<16x32xbf16>
    %172 = arith.mulf %171, %4 : vector<16x32xbf16>
    %173 = arith.addf %168, %172 : vector<16x32xbf16>
    %c0_107 = arith.constant 0 : index
    %c512 = arith.constant 512 : index
    %174 = vector.load %arg9[%c0_107, %c512] : memref<16x1024xbf16, #tpu.memory_space<vmem>>, vector<16x32xbf16>
    tpu.vector_store %arg9[%c0_107, %c512], %173 {strides = array<i32>} : memref<16x1024xbf16, #tpu.memory_space<vmem>>, vector<16x32xbf16>,
    %c0_108 = arith.constant 0 : index
    %c0_109 = arith.constant 0 : index
    %c17 = arith.constant 17 : index
    %175 = vector.load %arg3[%c0_108, %c0_109, %c17] : memref<1x16x32xbf16, #tpu.memory_space<vmem>>, vector<1x16x1xbf16>
    %176 = vector.shape_cast %175 : vector<1x16x1xbf16> to vector<16x1xbf16>
    %177 = vector.broadcast %176 : vector<16x1xbf16> to vector<16x32xbf16>
    %178 = arith.mulf %177, %3 : vector<16x32xbf16>
    %c0_110 = arith.constant 0 : index
    %c0_111 = arith.constant 0 : index
    %c17_112 = arith.constant 17 : index
    %179 = vector.load %arg4[%c0_110, %c0_111, %c17_112] : memref<1x16x32xbf16, #tpu.memory_space<vmem>>, vector<1x16x1xbf16>
    %180 = vector.shape_cast %179 : vector<1x16x1xbf16> to vector<16x1xbf16>
    %181 = vector.broadcast %180 : vector<16x1xbf16> to vector<16x32xbf16>
    %182 = arith.mulf %181, %4 : vector<16x32xbf16>
    %183 = arith.addf %178, %182 : vector<16x32xbf16>
    %c0_113 = arith.constant 0 : index
    %c544 = arith.constant 544 : index
    %184 = vector.load %arg9[%c0_113, %c544] : memref<16x1024xbf16, #tpu.memory_space<vmem>>, vector<16x32xbf16>
    tpu.vector_store %arg9[%c0_113, %c544], %183 {strides = array<i32>} : memref<16x1024xbf16, #tpu.memory_space<vmem>>, vector<16x32xbf16>,
    %c0_114 = arith.constant 0 : index
    %c0_115 = arith.constant 0 : index
    %c18 = arith.constant 18 : index
    %185 = vector.load %arg3[%c0_114, %c0_115, %c18] : memref<1x16x32xbf16, #tpu.memory_space<vmem>>, vector<1x16x1xbf16>
    %186 = vector.shape_cast %185 : vector<1x16x1xbf16> to vector<16x1xbf16>
    %187 = vector.broadcast %186 : vector<16x1xbf16> to vector<16x32xbf16>
    %188 = arith.mulf %187, %3 : vector<16x32xbf16>
    %c0_116 = arith.constant 0 : index
    %c0_117 = arith.constant 0 : index
    %c18_118 = arith.constant 18 : index
    %189 = vector.load %arg4[%c0_116, %c0_117, %c18_118] : memref<1x16x32xbf16, #tpu.memory_space<vmem>>, vector<1x16x1xbf16>
    %190 = vector.shape_cast %189 : vector<1x16x1xbf16> to vector<16x1xbf16>
    %191 = vector.broadcast %190 : vector<16x1xbf16> to vector<16x32xbf16>
    %192 = arith.mulf %191, %4 : vector<16x32xbf16>
    %193 = arith.addf %188, %192 : vector<16x32xbf16>
    %c0_119 = arith.constant 0 : index
    %c576 = arith.constant 576 : index
    %194 = vector.load %arg9[%c0_119, %c576] : memref<16x1024xbf16, #tpu.memory_space<vmem>>, vector<16x32xbf16>
    tpu.vector_store %arg9[%c0_119, %c576], %193 {strides = array<i32>} : memref<16x1024xbf16, #tpu.memory_space<vmem>>, vector<16x32xbf16>,
    %c0_120 = arith.constant 0 : index
    %c0_121 = arith.constant 0 : index
    %c19 = arith.constant 19 : index
    %195 = vector.load %arg3[%c0_120, %c0_121, %c19] : memref<1x16x32xbf16, #tpu.memory_space<vmem>>, vector<1x16x1xbf16>
    %196 = vector.shape_cast %195 : vector<1x16x1xbf16> to vector<16x1xbf16>
    %197 = vector.broadcast %196 : vector<16x1xbf16> to vector<16x32xbf16>
    %198 = arith.mulf %197, %3 : vector<16x32xbf16>
    %c0_122 = arith.constant 0 : index
    %c0_123 = arith.constant 0 : index
    %c19_124 = arith.constant 19 : index
    %199 = vector.load %arg4[%c0_122, %c0_123, %c19_124] : memref<1x16x32xbf16, #tpu.memory_space<vmem>>, vector<1x16x1xbf16>
    %200 = vector.shape_cast %199 : vector<1x16x1xbf16> to vector<16x1xbf16>
    %201 = vector.broadcast %200 : vector<16x1xbf16> to vector<16x32xbf16>
    %202 = arith.mulf %201, %4 : vector<16x32xbf16>
    %203 = arith.addf %198, %202 : vector<16x32xbf16>
    %c0_125 = arith.constant 0 : index
    %c608 = arith.constant 608 : index
    %204 = vector.load %arg9[%c0_125, %c608] : memref<16x1024xbf16, #tpu.memory_space<vmem>>, vector<16x32xbf16>
    tpu.vector_store %arg9[%c0_125, %c608], %203 {strides = array<i32>} : memref<16x1024xbf16, #tpu.memory_space<vmem>>, vector<16x32xbf16>,
    %c0_126 = arith.constant 0 : index
    %c0_127 = arith.constant 0 : index
    %c20 = arith.constant 20 : index
    %205 = vector.load %arg3[%c0_126, %c0_127, %c20] : memref<1x16x32xbf16, #tpu.memory_space<vmem>>, vector<1x16x1xbf16>
    %206 = vector.shape_cast %205 : vector<1x16x1xbf16> to vector<16x1xbf16>
    %207 = vector.broadcast %206 : vector<16x1xbf16> to vector<16x32xbf16>
    %208 = arith.mulf %207, %3 : vector<16x32xbf16>
    %c0_128 = arith.constant 0 : index
    %c0_129 = arith.constant 0 : index
    %c20_130 = arith.constant 20 : index
    %209 = vector.load %arg4[%c0_128, %c0_129, %c20_130] : memref<1x16x32xbf16, #tpu.memory_space<vmem>>, vector<1x16x1xbf16>
    %210 = vector.shape_cast %209 : vector<1x16x1xbf16> to vector<16x1xbf16>
    %211 = vector.broadcast %210 : vector<16x1xbf16> to vector<16x32xbf16>
    %212 = arith.mulf %211, %4 : vector<16x32xbf16>
    %213 = arith.addf %208, %212 : vector<16x32xbf16>
    %c0_131 = arith.constant 0 : index
    %c640 = arith.constant 640 : index
    %214 = vector.load %arg9[%c0_131, %c640] : memref<16x1024xbf16, #tpu.memory_space<vmem>>, vector<16x32xbf16>
    tpu.vector_store %arg9[%c0_131, %c640], %213 {strides = array<i32>} : memref<16x1024xbf16, #tpu.memory_space<vmem>>, vector<16x32xbf16>,
    %c0_132 = arith.constant 0 : index
    %c0_133 = arith.constant 0 : index
    %c21 = arith.constant 21 : index
    %215 = vector.load %arg3[%c0_132, %c0_133, %c21] : memref<1x16x32xbf16, #tpu.memory_space<vmem>>, vector<1x16x1xbf16>
    %216 = vector.shape_cast %215 : vector<1x16x1xbf16> to vector<16x1xbf16>
    %217 = vector.broadcast %216 : vector<16x1xbf16> to vector<16x32xbf16>
    %218 = arith.mulf %217, %3 : vector<16x32xbf16>
    %c0_134 = arith.constant 0 : index
    %c0_135 = arith.constant 0 : index
    %c21_136 = arith.constant 21 : index
    %219 = vector.load %arg4[%c0_134, %c0_135, %c21_136] : memref<1x16x32xbf16, #tpu.memory_space<vmem>>, vector<1x16x1xbf16>
    %220 = vector.shape_cast %219 : vector<1x16x1xbf16> to vector<16x1xbf16>
    %221 = vector.broadcast %220 : vector<16x1xbf16> to vector<16x32xbf16>
    %222 = arith.mulf %221, %4 : vector<16x32xbf16>
    %223 = arith.addf %218, %222 : vector<16x32xbf16>
    %c0_137 = arith.constant 0 : index
    %c672 = arith.constant 672 : index
    %224 = vector.load %arg9[%c0_137, %c672] : memref<16x1024xbf16, #tpu.memory_space<vmem>>, vector<16x32xbf16>
    tpu.vector_store %arg9[%c0_137, %c672], %223 {strides = array<i32>} : memref<16x1024xbf16, #tpu.memory_space<vmem>>, vector<16x32xbf16>,
    %c0_138 = arith.constant 0 : index
    %c0_139 = arith.constant 0 : index
    %c22 = arith.constant 22 : index
    %225 = vector.load %arg3[%c0_138, %c0_139, %c22] : memref<1x16x32xbf16, #tpu.memory_space<vmem>>, vector<1x16x1xbf16>
    %226 = vector.shape_cast %225 : vector<1x16x1xbf16> to vector<16x1xbf16>
    %227 = vector.broadcast %226 : vector<16x1xbf16> to vector<16x32xbf16>
    %228 = arith.mulf %227, %3 : vector<16x32xbf16>
    %c0_140 = arith.constant 0 : index
    %c0_141 = arith.constant 0 : index
    %c22_142 = arith.constant 22 : index
    %229 = vector.load %arg4[%c0_140, %c0_141, %c22_142] : memref<1x16x32xbf16, #tpu.memory_space<vmem>>, vector<1x16x1xbf16>
    %230 = vector.shape_cast %229 : vector<1x16x1xbf16> to vector<16x1xbf16>
    %231 = vector.broadcast %230 : vector<16x1xbf16> to vector<16x32xbf16>
    %232 = arith.mulf %231, %4 : vector<16x32xbf16>
    %233 = arith.addf %228, %232 : vector<16x32xbf16>
    %c0_143 = arith.constant 0 : index
    %c704 = arith.constant 704 : index
    %234 = vector.load %arg9[%c0_143, %c704] : memref<16x1024xbf16, #tpu.memory_space<vmem>>, vector<16x32xbf16>
    tpu.vector_store %arg9[%c0_143, %c704], %233 {strides = array<i32>} : memref<16x1024xbf16, #tpu.memory_space<vmem>>, vector<16x32xbf16>,
    %c0_144 = arith.constant 0 : index
    %c0_145 = arith.constant 0 : index
    %c23 = arith.constant 23 : index
    %235 = vector.load %arg3[%c0_144, %c0_145, %c23] : memref<1x16x32xbf16, #tpu.memory_space<vmem>>, vector<1x16x1xbf16>
    %236 = vector.shape_cast %235 : vector<1x16x1xbf16> to vector<16x1xbf16>
    %237 = vector.broadcast %236 : vector<16x1xbf16> to vector<16x32xbf16>
    %238 = arith.mulf %237, %3 : vector<16x32xbf16>
    %c0_146 = arith.constant 0 : index
    %c0_147 = arith.constant 0 : index
    %c23_148 = arith.constant 23 : index
    %239 = vector.load %arg4[%c0_146, %c0_147, %c23_148] : memref<1x16x32xbf16, #tpu.memory_space<vmem>>, vector<1x16x1xbf16>
    %240 = vector.shape_cast %239 : vector<1x16x1xbf16> to vector<16x1xbf16>
    %241 = vector.broadcast %240 : vector<16x1xbf16> to vector<16x32xbf16>
    %242 = arith.mulf %241, %4 : vector<16x32xbf16>
    %243 = arith.addf %238, %242 : vector<16x32xbf16>
    %c0_149 = arith.constant 0 : index
    %c736 = arith.constant 736 : index
    %244 = vector.load %arg9[%c0_149, %c736] : memref<16x1024xbf16, #tpu.memory_space<vmem>>, vector<16x32xbf16>
    tpu.vector_store %arg9[%c0_149, %c736], %243 {strides = array<i32>} : memref<16x1024xbf16, #tpu.memory_space<vmem>>, vector<16x32xbf16>,
    %c0_150 = arith.constant 0 : index
    %c0_151 = arith.constant 0 : index
    %c24 = arith.constant 24 : index
    %245 = vector.load %arg3[%c0_150, %c0_151, %c24] : memref<1x16x32xbf16, #tpu.memory_space<vmem>>, vector<1x16x1xbf16>
    %246 = vector.shape_cast %245 : vector<1x16x1xbf16> to vector<16x1xbf16>
    %247 = vector.broadcast %246 : vector<16x1xbf16> to vector<16x32xbf16>
    %248 = arith.mulf %247, %3 : vector<16x32xbf16>
    %c0_152 = arith.constant 0 : index
    %c0_153 = arith.constant 0 : index
    %c24_154 = arith.constant 24 : index
    %249 = vector.load %arg4[%c0_152, %c0_153, %c24_154] : memref<1x16x32xbf16, #tpu.memory_space<vmem>>, vector<1x16x1xbf16>
    %250 = vector.shape_cast %249 : vector<1x16x1xbf16> to vector<16x1xbf16>
    %251 = vector.broadcast %250 : vector<16x1xbf16> to vector<16x32xbf16>
    %252 = arith.mulf %251, %4 : vector<16x32xbf16>
    %253 = arith.addf %248, %252 : vector<16x32xbf16>
    %c0_155 = arith.constant 0 : index
    %c768 = arith.constant 768 : index
    %254 = vector.load %arg9[%c0_155, %c768] : memref<16x1024xbf16, #tpu.memory_space<vmem>>, vector<16x32xbf16>
    tpu.vector_store %arg9[%c0_155, %c768], %253 {strides = array<i32>} : memref<16x1024xbf16, #tpu.memory_space<vmem>>, vector<16x32xbf16>,
    %c0_156 = arith.constant 0 : index
    %c0_157 = arith.constant 0 : index
    %c25 = arith.constant 25 : index
    %255 = vector.load %arg3[%c0_156, %c0_157, %c25] : memref<1x16x32xbf16, #tpu.memory_space<vmem>>, vector<1x16x1xbf16>
    %256 = vector.shape_cast %255 : vector<1x16x1xbf16> to vector<16x1xbf16>
    %257 = vector.broadcast %256 : vector<16x1xbf16> to vector<16x32xbf16>
    %258 = arith.mulf %257, %3 : vector<16x32xbf16>
    %c0_158 = arith.constant 0 : index
    %c0_159 = arith.constant 0 : index
    %c25_160 = arith.constant 25 : index
    %259 = vector.load %arg4[%c0_158, %c0_159, %c25_160] : memref<1x16x32xbf16, #tpu.memory_space<vmem>>, vector<1x16x1xbf16>
    %260 = vector.shape_cast %259 : vector<1x16x1xbf16> to vector<16x1xbf16>
    %261 = vector.broadcast %260 : vector<16x1xbf16> to vector<16x32xbf16>
    %262 = arith.mulf %261, %4 : vector<16x32xbf16>
    %263 = arith.addf %258, %262 : vector<16x32xbf16>
    %c0_161 = arith.constant 0 : index
    %c800 = arith.constant 800 : index
    %264 = vector.load %arg9[%c0_161, %c800] : memref<16x1024xbf16, #tpu.memory_space<vmem>>, vector<16x32xbf16>
    tpu.vector_store %arg9[%c0_161, %c800], %263 {strides = array<i32>} : memref<16x1024xbf16, #tpu.memory_space<vmem>>, vector<16x32xbf16>,
    %c0_162 = arith.constant 0 : index
    %c0_163 = arith.constant 0 : index
    %c26 = arith.constant 26 : index
    %265 = vector.load %arg3[%c0_162, %c0_163, %c26] : memref<1x16x32xbf16, #tpu.memory_space<vmem>>, vector<1x16x1xbf16>
    %266 = vector.shape_cast %265 : vector<1x16x1xbf16> to vector<16x1xbf16>
    %267 = vector.broadcast %266 : vector<16x1xbf16> to vector<16x32xbf16>
    %268 = arith.mulf %267, %3 : vector<16x32xbf16>
    %c0_164 = arith.constant 0 : index
    %c0_165 = arith.constant 0 : index
    %c26_166 = arith.constant 26 : index
    %269 = vector.load %arg4[%c0_164, %c0_165, %c26_166] : memref<1x16x32xbf16, #tpu.memory_space<vmem>>, vector<1x16x1xbf16>
    %270 = vector.shape_cast %269 : vector<1x16x1xbf16> to vector<16x1xbf16>
    %271 = vector.broadcast %270 : vector<16x1xbf16> to vector<16x32xbf16>
    %272 = arith.mulf %271, %4 : vector<16x32xbf16>
    %273 = arith.addf %268, %272 : vector<16x32xbf16>
    %c0_167 = arith.constant 0 : index
    %c832 = arith.constant 832 : index
    %274 = vector.load %arg9[%c0_167, %c832] : memref<16x1024xbf16, #tpu.memory_space<vmem>>, vector<16x32xbf16>
    tpu.vector_store %arg9[%c0_167, %c832], %273 {strides = array<i32>} : memref<16x1024xbf16, #tpu.memory_space<vmem>>, vector<16x32xbf16>,
    %c0_168 = arith.constant 0 : index
    %c0_169 = arith.constant 0 : index
    %c27 = arith.constant 27 : index
    %275 = vector.load %arg3[%c0_168, %c0_169, %c27] : memref<1x16x32xbf16, #tpu.memory_space<vmem>>, vector<1x16x1xbf16>
    %276 = vector.shape_cast %275 : vector<1x16x1xbf16> to vector<16x1xbf16>
    %277 = vector.broadcast %276 : vector<16x1xbf16> to vector<16x32xbf16>
    %278 = arith.mulf %277, %3 : vector<16x32xbf16>
    %c0_170 = arith.constant 0 : index
    %c0_171 = arith.constant 0 : index
    %c27_172 = arith.constant 27 : index
    %279 = vector.load %arg4[%c0_170, %c0_171, %c27_172] : memref<1x16x32xbf16, #tpu.memory_space<vmem>>, vector<1x16x1xbf16>
    %280 = vector.shape_cast %279 : vector<1x16x1xbf16> to vector<16x1xbf16>
    %281 = vector.broadcast %280 : vector<16x1xbf16> to vector<16x32xbf16>
    %282 = arith.mulf %281, %4 : vector<16x32xbf16>
    %283 = arith.addf %278, %282 : vector<16x32xbf16>
    %c0_173 = arith.constant 0 : index
    %c864 = arith.constant 864 : index
    %284 = vector.load %arg9[%c0_173, %c864] : memref<16x1024xbf16, #tpu.memory_space<vmem>>, vector<16x32xbf16>
    tpu.vector_store %arg9[%c0_173, %c864], %283 {strides = array<i32>} : memref<16x1024xbf16, #tpu.memory_space<vmem>>, vector<16x32xbf16>,
    %c0_174 = arith.constant 0 : index
    %c0_175 = arith.constant 0 : index
    %c28 = arith.constant 28 : index
    %285 = vector.load %arg3[%c0_174, %c0_175, %c28] : memref<1x16x32xbf16, #tpu.memory_space<vmem>>, vector<1x16x1xbf16>
    %286 = vector.shape_cast %285 : vector<1x16x1xbf16> to vector<16x1xbf16>
    %287 = vector.broadcast %286 : vector<16x1xbf16> to vector<16x32xbf16>
    %288 = arith.mulf %287, %3 : vector<16x32xbf16>
    %c0_176 = arith.constant 0 : index
    %c0_177 = arith.constant 0 : index
    %c28_178 = arith.constant 28 : index
    %289 = vector.load %arg4[%c0_176, %c0_177, %c28_178] : memref<1x16x32xbf16, #tpu.memory_space<vmem>>, vector<1x16x1xbf16>
    %290 = vector.shape_cast %289 : vector<1x16x1xbf16> to vector<16x1xbf16>
    %291 = vector.broadcast %290 : vector<16x1xbf16> to vector<16x32xbf16>
    %292 = arith.mulf %291, %4 : vector<16x32xbf16>
    %293 = arith.addf %288, %292 : vector<16x32xbf16>
    %c0_179 = arith.constant 0 : index
    %c896 = arith.constant 896 : index
    %294 = vector.load %arg9[%c0_179, %c896] : memref<16x1024xbf16, #tpu.memory_space<vmem>>, vector<16x32xbf16>
    tpu.vector_store %arg9[%c0_179, %c896], %293 {strides = array<i32>} : memref<16x1024xbf16, #tpu.memory_space<vmem>>, vector<16x32xbf16>,
    %c0_180 = arith.constant 0 : index
    %c0_181 = arith.constant 0 : index
    %c29 = arith.constant 29 : index
    %295 = vector.load %arg3[%c0_180, %c0_181, %c29] : memref<1x16x32xbf16, #tpu.memory_space<vmem>>, vector<1x16x1xbf16>
    %296 = vector.shape_cast %295 : vector<1x16x1xbf16> to vector<16x1xbf16>
    %297 = vector.broadcast %296 : vector<16x1xbf16> to vector<16x32xbf16>
    %298 = arith.mulf %297, %3 : vector<16x32xbf16>
    %c0_182 = arith.constant 0 : index
    %c0_183 = arith.constant 0 : index
    %c29_184 = arith.constant 29 : index
    %299 = vector.load %arg4[%c0_182, %c0_183, %c29_184] : memref<1x16x32xbf16, #tpu.memory_space<vmem>>, vector<1x16x1xbf16>
    %300 = vector.shape_cast %299 : vector<1x16x1xbf16> to vector<16x1xbf16>
    %301 = vector.broadcast %300 : vector<16x1xbf16> to vector<16x32xbf16>
    %302 = arith.mulf %301, %4 : vector<16x32xbf16>
    %303 = arith.addf %298, %302 : vector<16x32xbf16>
    %c0_185 = arith.constant 0 : index
    %c928 = arith.constant 928 : index
    %304 = vector.load %arg9[%c0_185, %c928] : memref<16x1024xbf16, #tpu.memory_space<vmem>>, vector<16x32xbf16>
    tpu.vector_store %arg9[%c0_185, %c928], %303 {strides = array<i32>} : memref<16x1024xbf16, #tpu.memory_space<vmem>>, vector<16x32xbf16>,
    %c0_186 = arith.constant 0 : index
    %c0_187 = arith.constant 0 : index
    %c30 = arith.constant 30 : index
    %305 = vector.load %arg3[%c0_186, %c0_187, %c30] : memref<1x16x32xbf16, #tpu.memory_space<vmem>>, vector<1x16x1xbf16>
    %306 = vector.shape_cast %305 : vector<1x16x1xbf16> to vector<16x1xbf16>
    %307 = vector.broadcast %306 : vector<16x1xbf16> to vector<16x32xbf16>
    %308 = arith.mulf %307, %3 : vector<16x32xbf16>
    %c0_188 = arith.constant 0 : index
    %c0_189 = arith.constant 0 : index
    %c30_190 = arith.constant 30 : index
    %309 = vector.load %arg4[%c0_188, %c0_189, %c30_190] : memref<1x16x32xbf16, #tpu.memory_space<vmem>>, vector<1x16x1xbf16>
    %310 = vector.shape_cast %309 : vector<1x16x1xbf16> to vector<16x1xbf16>
    %311 = vector.broadcast %310 : vector<16x1xbf16> to vector<16x32xbf16>
    %312 = arith.mulf %311, %4 : vector<16x32xbf16>
    %313 = arith.addf %308, %312 : vector<16x32xbf16>
    %c0_191 = arith.constant 0 : index
    %c960 = arith.constant 960 : index
    %314 = vector.load %arg9[%c0_191, %c960] : memref<16x1024xbf16, #tpu.memory_space<vmem>>, vector<16x32xbf16>
    tpu.vector_store %arg9[%c0_191, %c960], %313 {strides = array<i32>} : memref<16x1024xbf16, #tpu.memory_space<vmem>>, vector<16x32xbf16>,
    %c0_192 = arith.constant 0 : index
    %c0_193 = arith.constant 0 : index
    %c31 = arith.constant 31 : index
    %315 = vector.load %arg3[%c0_192, %c0_193, %c31] : memref<1x16x32xbf16, #tpu.memory_space<vmem>>, vector<1x16x1xbf16>
    %316 = vector.shape_cast %315 : vector<1x16x1xbf16> to vector<16x1xbf16>
    %317 = vector.broadcast %316 : vector<16x1xbf16> to vector<16x32xbf16>
    %318 = arith.mulf %317, %3 : vector<16x32xbf16>
    %c0_194 = arith.constant 0 : index
    %c0_195 = arith.constant 0 : index
    %c31_196 = arith.constant 31 : index
    %319 = vector.load %arg4[%c0_194, %c0_195, %c31_196] : memref<1x16x32xbf16, #tpu.memory_space<vmem>>, vector<1x16x1xbf16>
    %320 = vector.shape_cast %319 : vector<1x16x1xbf16> to vector<16x1xbf16>
    %321 = vector.broadcast %320 : vector<16x1xbf16> to vector<16x32xbf16>
    %322 = arith.mulf %321, %4 : vector<16x32xbf16>
    %323 = arith.addf %318, %322 : vector<16x32xbf16>
    %c0_197 = arith.constant 0 : index
    %c992 = arith.constant 992 : index
    %324 = vector.load %arg9[%c0_197, %c992] : memref<16x1024xbf16, #tpu.memory_space<vmem>>, vector<16x32xbf16>
    tpu.vector_store %arg9[%c0_197, %c992], %323 {strides = array<i32>} : memref<16x1024xbf16, #tpu.memory_space<vmem>>, vector<16x32xbf16>,
    %325 = arith.index_cast %arg1 : i32 to index
    %326 = arith.index_cast %arg2 : i32 to index
    %c0_198 = arith.constant 0 : index
    %c0_199 = arith.constant 0 : index
    %327 = vector.load %arg7[%325, %326, %c0_198, %c0_199] : memref<2x1x1024x128xbf16, #tpu.memory_space<vmem>>, vector<1x1x1024x128xbf16>
    %328 = vector.shape_cast %327 : vector<1x1x1024x128xbf16> to vector<1024x128xbf16>
    %c0_200 = arith.constant 0 : index
    %c0_201 = arith.constant 0 : index
    %329 = vector.load %arg8[%c0_200, %c0_201] : memref<16x128xf32, #tpu.memory_space<vmem>>, vector<16x128xf32>
    %c0_202 = arith.constant 0 : index
    %c0_203 = arith.constant 0 : index
    %330 = vector.load %arg9[%c0_202, %c0_203] : memref<16x1024xbf16, #tpu.memory_space<vmem>>, vector<16x1024xbf16>
    %cst = arith.constant dense<0.000000e+00> : vector<16x128xf32>
    %331 = tpu.matmul %330, %328, %cst {dimension_numbers = #tpu.dot_dimension_numbers<[1], [0], [0], [1], [0, 0, 1, 1], [], []>} : vector<16x1024xbf16>, vector<1024x128xbf16>, vector<16x128xf32> -> vector<16x128xf32>
    %332 = arith.addf %329, %331 : vector<16x128xf32>
    %c0_204 = arith.constant 0 : index
    %c0_205 = arith.constant 0 : index
    %333 = vector.load %arg8[%c0_204, %c0_205] : memref<16x128xf32, #tpu.memory_space<vmem>>, vector<16x128xf32>
    tpu.vector_store %arg8[%c0_204, %c0_205], %332 {strides = array<i32>} : memref<16x128xf32, #tpu.memory_space<vmem>>, vector<16x128xf32>,
    return
  }
  func.func @transform_0(%arg0: i32, %arg1: i32, %arg2: i32) -> (i32, i32, i32) {
    %c0_i32 = arith.constant 0 : i32
    %c0_i32_0 = arith.constant 0 : i32
    return %arg2, %arg0, %c0_i32 : i32, i32, i32
  }
  func.func @transform_1(%arg0: i32, %arg1: i32, %arg2: i32) -> (i32, i32, i32) {
    %c0_i32 = arith.constant 0 : i32
    %c0_i32_0 = arith.constant 0 : i32
    return %arg2, %arg0, %c0_i32 : i32, i32, i32
  }
  func.func @transform_2(%arg0: i32, %arg1: i32, %arg2: i32) -> (i32, i32) {
    %c0_i32 = arith.constant 0 : i32
    %c0_i32_0 = arith.constant 0 : i32
    return %arg0, %c0_i32 : i32, i32
  }
  func.func @transform_3(%arg0: i32, %arg1: i32, %arg2: i32) -> (i32, i32) {
    %c0_i32 = arith.constant 0 : i32
    %c0_i32_0 = arith.constant 0 : i32
    return %arg0, %c0_i32 : i32, i32
  }
  func.func @transform_4(%arg0: i32, %arg1: i32, %arg2: i32) -> (i32, i32, i32, i32) {
    %c0_i32 = arith.constant 0 : i32
    %c0_i32_0 = arith.constant 0 : i32
    %c0_i32_1 = arith.constant 0 : i32
    %c0_i32_2 = arith.constant 0 : i32
    %c0_i32_3 = arith.constant 0 : i32
    return %c0_i32, %c0_i32_0, %c0_i32_1, %c0_i32_2 : i32, i32, i32, i32
  }
  func.func @transform_5(%arg0: i32, %arg1: i32, %arg2: i32) -> (i32, i32) {
    %c0_i32 = arith.constant 0 : i32
    return %arg0, %arg1 : i32, i32
  }
}

</mosaic_0001>

<bundles_post_ra>
// kernel: _lambda_.1
= control target key start
LH: loop header
LB: loop body
LE: loop exit
PB: predicated region body
PF: predicated region fallthrough
CT: control target
= control target key end

     0   :  { %10 = vsyncpa [#allocation4], 0  ;;  %s3945_s18 = smov 0   ;;  %s3947_s19 = smov 0   ;;  %s5032_s0 = inlined_call_operand.vmem [shape: bf16[1,16,32], index: 0, kind: input, shape index: {}]   ;;  %s5033_s1 = inlined_call_operand.vmem [shape: bf16[1,16,32], index: 1, kind: input, shape index: {}]   ;;  %s5034_s2 = inlined_call_operand.vmem [shape: bf16[16,32], index: 2, kind: input, shape index: {}]   ;;  %s5035_s3 = inlined_call_operand.vmem [shape: bf16[16,32], index: 3, kind: input, shape index: {}]   ;;  %s5036_s4 = inlined_call_operand.hbm [shape: bf16[2,1,1024,128], index: 4, kind: input, shape index: {}]   ;;  %s5037_s5 = inlined_call_operand.vmem [shape: f32[16,256], index: 5, kind: output, shape index: {}]  }
   0x1   :  { %s3949_s20 = smov 0   ;;  %s3951_s21 = smov 0  }
   0x2   :  { %s3953_s22 = smov 0  }
   0x3 LB: > { %s3404_s23 = sadd.s32 4294967295, %s3874_s22   ;;  %s31_s24 = sadd.s32 1, %s3870_s21  ;;  %s3874_s22 = sphi %s3953_s22, %s16_s22   ;;  %s3870_s21 = sphi %s3951_s21, %s5044_s21   ;;  %s3866_s20 = sphi %s3949_s20, %s5043_s20   ;;  %s3862_s19 = sphi %s3947_s19, %s5042_s19   ;;  %s3858_s18 = sphi %s3945_s18, %s5041_s18  }
   0x4   : > { %p33_p0 = scmp.ge.s32.totalorder %s31_s24, 2  ;;  %s173_s25 = sadd.s32 1, %s3862_s19 }
   0x5   : > { %p183_p1 = scmp.ne.s32.totalorder %s3862_s19, %s3858_s18  ;;  %p184_p2 = scmp.eq.s32.totalorder %s3404_s23, 1 }
   0x6   : > { %s5046_s24 = smov (%p33_p0, %s31_s24), 0  ;;  %p3406_p4 = scmp.ge.s32.totalorder %s3874_s22, 1 }
   0x7   : > { %p3977_p3 = por %p184_p2, %p183_p1  ;;  %s169_s27 = ssub.s32 %s3870_s21, %s5046_s24 }
   0x8   : > { %p197_p5 = scmp.lt.s32.totalorder %s3874_s22, 3  ;;  %p171_p6 = scmp.eq.s32.totalorder %s169_s27, 0 }
   0x9   : > { %p3989_p8 = scmp.eq.s32.totalorder %s3404_s23, 0  ;;  %s3876_s6 = smov [#allocation3]  }
   0xa   : > { %p3985_p7 = pnand %p3406_p4, %p197_p5  ;;  %s253_s7 = sshll.u32 %s3876_s6, 4  ;;  %s254_s7 = int_to_ptr.vmem [resolvable:$true] %s253_s7 }
   0xb   : > { %s3994_s30 = scalar_select %p171_p6, %s3862_s19, %s173_s25  }
   0xc   : > { %p3586_p9 = pneg %p3985_p7  ;;  %s3817_s8 = scalar_lea.vmem %s254_s7, 16384 }
   0xd   : > { %p3818_p12 = scmp.ne.s32.totalorder %s254_s7, %s3817_s8  ;;  %p3825_p1 = scmp.lt.s32.totalorder %s254_s7, %s254_s7 }
   0xe   : > { %p3587_p10 = pnand %p3989_p8, %p3586_p9  ;;  %p3826_p2 = scmp.lt.s32.totalorder %s3817_s8, %s3817_s8 }
  0x10   : > { %p3808_p11 = pneg %p3587_p10  ;;  %p3827_p4 = por %p3826_p2, %p3825_p1 }
  0x12   : > { %p3820_p13 = pnand %p3818_p12, %p3808_p11 }
  0x14   : > { %p3821_p0 = pneg %p3820_p13 }
  0x16   : > { %p3828_p5 = pnand %p3827_p4, %p3821_p0 }
  0x18   : > { %3831 = shalt.err (!%p3828_p5)
}
  0x19   : > { %s3877_s9 = smov 64   ;;  %s3878_s10 = smov 4  }
  0x1a   : > { %3589 = dma.hbm_to_vmem [thread:$0]  (!%p3587_p10), %s5036_s4, 16384, %s254_s7, [#allocation4], %s3877_s9, %s3877_s9, %s3878_s10  }
  0x1b   : > { %269 = sbr.rel (%p3985_p7) target bundleno = 1052 (0x41c), region = 40 }
  0x20   : > { %3853 = dma.done.wait (%p3989_p8), [#allocation4], 16384  }
  0x21   : > { %3855 = vsyncadd (%p3989_p8), [#allocation4], 4294950912  ;;  %v3879_v0 = vmov 0   ;;  %v391_v1 = vld [vmem:[%s5033_s1] sm:$0xf]  ;;  %v3880_v7 = vmov 1   ;;  %v373_v57 = vlaneseq }
  0x22   : > { %3673 = vset.pattern.permute.xlu1 %v3879_v0  ;;  %3672 = vset.pattern.permute.xlu0 %v3879_v0  ;;  %v363_v2 = vld [vmem:[%s5032_s0] sm:$0xf]  ;;  %v392_v3 = vld [vmem:[%s5033_s1 + $0x4] sm:$0xf]  ;;  %v3881_v12 = vmov 2   ;;  %v3882_v15 = vmov 3  }
  0x23   : > { %395 = vperm.xlu1 %3673, %v391_v1   ;;  %367 = vperm.xlu0 %3672, %v363_v2   ;;  %v364_v4 = vld [vmem:[%s5032_s0 + $0x4] sm:$0xf]  ;;  %v424_v6 = vld [vmem:[%s5032_s0] sm:$0xf]  ;;  %v3883_v20 = vmov 4   ;;  %v3884_v23 = vmov 5  }
  0x24   : > { %v425_v5 = vld [vmem:[%s5032_s0 + $0x4] sm:$0xf]  ;;  %v452_v8 = vld [vmem:[%s5033_s1] sm:$0xf]  ;;  %v3885_v29 = vmov 6   ;;  %v3886_v32 = vmov 7  }
  0x25   : > { %v453_v9 = vld [vmem:[%s5033_s1 + $0x4] sm:$0xf]  ;;  %v493_v10 = vld [vmem:[%s5032_s0] sm:$0xf]  ;;  %v3887_v37 = vmov 8   ;;  %v3888_v40 = vmov 9  }
  0x26   : > { %v494_v11 = vld [vmem:[%s5032_s0 + $0x4] sm:$0xf]  ;;  %v521_v13 = vld [vmem:[%s5033_s1] sm:$0xf]  ;;  %v3889_v45 = vmov 10   ;;  %v3891_v58 = vmov 11  }
  0x27   : > { %407 = vperm.xlu1 %3673, %v392_v3   ;;  %379 = vperm.xlu0 %3672, %v364_v4   ;;  %v562_v14 = vld [vmem:[%s5032_s0] sm:$0xf]  ;;  %v522_v16 = vld [vmem:[%s5033_s1 + $0x4] sm:$0xf]  ;;  %v3890_v55 = vmov 839922192  }
  0x28   : > { %v591_v17 = vld [vmem:[%s5033_s1 + $0x4] sm:$0xf]  ;;  %v590_v21 = vld [vmem:[%s5033_s1] sm:$0xf]  ;;  %v371_v56 = vunpack.c.l.s4 %v3890_v55  ;;  %v374_v60 = vshrl.u32 %v373_v57, 7  ;;  %vm421_vm0 = vcmask 257024  }
  0x29   : > { %v563_v18 = vld [vmem:[%s5032_s0 + $0x4] sm:$0xf]  ;;  %v691_v22 = vld [vmem:[%s5032_s0] sm:$0xf]  ;;  %s3892_s7 = smov 32   ;;  %s3893_s8 = smov 64  }
  0x2a   : > { %v632_v19 = vld [vmem:[%s5032_s0 + $0x4] sm:$0xf]  ;;  %v631_v24 = vld [vmem:[%s5032_s0] sm:$0xf]  ;;  %v372_v59 = vunpack.c.0.s8 %v371_v56  ;;  %s3894_s9 = smov 96   ;;  %s3493_s10 = sshll.u32 %s3866_s20, 9 }
  0x2b   : > { %3675 = vset.pattern.permute.xlu1 %v3880_v7  ;;  %3674 = vset.pattern.permute.xlu0 %v3880_v7  ;;  %v720_v25 = vld [vmem:[%s5033_s1 + $0x4] sm:$0xf]  ;;  %v659_v26 = vld [vmem:[%s5033_s1] sm:$0xf]  ;;  %s4212_s11 = scalar_lea.vmem [#allocation3], %s3493_s10  ;;  %vm490_vm1 = vcmask 519424  }
  0x2c   : > { %440 = vperm.xlu1 %3675, %v425_v5   ;;  %428 = vperm.xlu0 %3674, %v424_v6   ;;  %v760_v27 = vld [vmem:[%s5032_s0 + $0x4] sm:$0xf]  ;;  %v827_v30 = vld [vmem:[%s5032_s0] sm:$0xf]  ;;  %v4141_v61 = vsub.s32 %v372_v59, %v374_v60  ;;  %vm559_vm2 = vcmask 781824   ;;  %vm628_vm3 = vcmask 1044224  }
  0x2d   : > { %v660_v28 = vld [vmem:[%s5033_s1 + $0x4] sm:$0xf]  ;;  %v719_v34 = vld [vmem:[%s5033_s1] sm:$0xf] }
  0x2e   : > { %v692_v31 = vld [vmem:[%s5032_s0 + $0x4] sm:$0xf]  ;;  %v759_v36 = vld [vmem:[%s5032_s0] sm:$0xf] }
  0x2f   : > { %v856_v33 = vld [vmem:[%s5033_s1 + $0x4] sm:$0xf]  ;;  %v955_v38 = vld [vmem:[%s5032_s0] sm:$0xf] }
  0x30   : > { %456 = vperm.xlu1 %3675, %v452_v8   ;;  %468 = vperm.xlu0 %3674, %v453_v9   ;;  %v896_v35 = vld [vmem:[%s5032_s0 + $0x4] sm:$0xf]  ;;  %v787_v39 = vld [vmem:[%s5033_s1] sm:$0xf] }
  0x31   : > { %v984_v41 = vld [vmem:[%s5033_s1 + $0x4] sm:$0xf]  ;;  %v855_v46 = vld [vmem:[%s5033_s1] sm:$0xf] }
  0x32   : > { %v788_v42 = vld [vmem:[%s5033_s1 + $0x4] sm:$0xf]  ;;  %v895_v47 = vld [vmem:[%s5032_s0] sm:$0xf] }
  0x33   : > { %v1024_v43 = vld [vmem:[%s5032_s0 + $0x4] sm:$0xf]  ;;  %v923_v48 = vld [vmem:[%s5033_s1] sm:$0xf] }
  0x34   : > { %3676 = vset.pattern.permute.xlu1 %v3881_v12  ;;  %3677 = vset.pattern.permute.xlu0 %v3881_v12  ;;  %v828_v44 = vld [vmem:[%s5032_s0 + $0x4] sm:$0xf]  ;;  %v983_v51 = vld [vmem:[%s5033_s1] sm:$0xf] }
  0x35   : > { %497 = vperm.xlu1 %3676, %v493_v10   ;;  %509 = vperm.xlu0 %3677, %v494_v11   ;;  %v924_v49 = vld [vmem:[%s5033_s1 + $0x4] sm:$0xf]  ;;  %v1023_v52 = vld [vmem:[%s5032_s0] sm:$0xf] }
  0x36   : > { %v956_v50 = vld [vmem:[%s5032_s0 + $0x4] sm:$0xf]  ;;  %v1051_v53 = vld [vmem:[%s5033_s1] sm:$0xf] }
  0x37   : > { %v1052_v54 = vld [vmem:[%s5033_s1 + $0x4] sm:$0xf]  ;;  %v4146_v63 = vld [vmem:[%s5035_s3] sm:$0xf] }
  0x38   : > { %v4151_v1 = vld [vmem:[%s5034_s2] sm:$0xf]  ;;  %v4160_v7 = vld [vmem:[%s5035_s3 + $0x4] sm:$0xf] }
  0x39   : > { %525 = vperm.xlu1 %3676, %v521_v13   ;;  %3678 = vset.pattern.permute.xlu0 %v3882_v15  ;;  %v4165_v9 = vld [vmem:[%s5034_s2 + $0x4] sm:$0xf] }
  0x3a   : > { %566 = vperm.xlu0 %3678, %v562_v14  }
  0x3d   : > { %537 = vperm.xlu1 %3676, %v522_v16  }
  0x3e   : > { %606 = vperm.xlu0 %3678, %v591_v17  }
  0x41   : > { %3679 = vset.pattern.permute.xlu1 %v3882_v15 }
  0x42   : > { %578 = vperm.xlu1 %3679, %v563_v18   ;;  %3681 = vset.pattern.permute.xlu0 %v3883_v20 }
  0x43   : > { %647 = vperm.xlu0 %3681, %v632_v19  }
  0x46   : > { %594 = vperm.xlu1 %3679, %v590_v21  }
  0x47   : > { %3682 = vset.pattern.permute.xlu0 %v3884_v23 }
  0x48   : > { %695 = vperm.xlu0 %3682, %v691_v22  }
  0x4a   : > { %3680 = vset.pattern.permute.xlu1 %v3883_v20 }
  0x4b   : > { %635 = vperm.xlu1 %3680, %v631_v24  }
  0x4c   : > { %735 = vperm.xlu0 %3682, %v720_v25  }
  0x4f   : > { %663 = vperm.xlu1 %3680, %v659_v26  }
  0x50   : > { %3685 = vset.pattern.permute.xlu0 %v3885_v29 }
  0x51   : > { %775 = vperm.xlu0 %3685, %v760_v27  }
  0x53   : > { %675 = vperm.xlu1 %3680, %v660_v28  }
  0x55   : > { %3686 = vset.pattern.permute.xlu0 %v3886_v32 }
  0x56   : > { %831 = vperm.xlu0 %3686, %v827_v30  }
  0x57   : > { %3683 = vset.pattern.permute.xlu1 %v3884_v23 }
  0x58   : > { %707 = vperm.xlu1 %3683, %v692_v31  }
  0x5a   : > { %871 = vperm.xlu0 %3686, %v856_v33  }
  0x5c   : > { %723 = vperm.xlu1 %3683, %v719_v34  }
  0x5e   : > { %3689 = vset.pattern.permute.xlu0 %v3887_v37 }
  0x5f   : > { %911 = vperm.xlu0 %3689, %v896_v35  }
  0x60   : > { %3684 = vset.pattern.permute.xlu1 %v3885_v29 }
  0x61   : > { %763 = vperm.xlu1 %3684, %v759_v36  }
  0x63   : > { %3690 = vset.pattern.permute.xlu0 %v3888_v40 }
  0x64   : > { %959 = vperm.xlu0 %3690, %v955_v38  }
  0x65   : > { %791 = vperm.xlu1 %3684, %v787_v39  }
  0x68   : > { %999 = vperm.xlu0 %3690, %v984_v41  }
  0x69   : > { %803 = vperm.xlu1 %3684, %v788_v42  }
  0x6c   : > { %3693 = vset.pattern.permute.xlu0 %v3889_v45 }
  0x6d   : > { %3687 = vset.pattern.permute.xlu1 %v3886_v32  ;;  %1039 = vperm.xlu0 %3693, %v1024_v43  }
  0x6e   : > { %843 = vperm.xlu1 %3687, %v828_v44  }
  0x71   : > { %3694 = vset.pattern.permute.xlu0 %v3891_v58 }
  0x72   : > { %859 = vperm.xlu1 %3687, %v855_v46  }
  0x76   : > { %3688 = vset.pattern.permute.xlu1 %v3887_v37 }
  0x77   : > { %899 = vperm.xlu1 %3688, %v895_v47  }
  0x7b   : > { %927 = vperm.xlu1 %3688, %v923_v48  }
  0x7f   : > { %939 = vperm.xlu1 %3688, %v924_v49  }
  0x83   : > { %3691 = vset.pattern.permute.xlu1 %v3888_v40 }
  0x84   : > { %971 = vperm.xlu1 %3691, %v956_v50  }
  0x88   : > { %987 = vperm.xlu1 %3691, %v983_v51  }
  0x8c   : > { %3692 = vset.pattern.permute.xlu1 %v3889_v45 }
  0x8d   : > { %1027 = vperm.xlu1 %3692, %v1023_v52  }
  0x91   : > { %1055 = vperm.xlu1 %3692, %v1051_v53  }
  0x95   : > { %1067 = vperm.xlu1 %3692, %v1052_v54  }
  0x99   : > { %3695 = vset.pattern.permute.xlu1 %v3891_v58 }
  0x9e   : > { %v396_v62 = vpop.permute.xlu1 %395  ;;  %v368_v0 = vpop.permute.xlu0 %367 }
  0x9f   : > { %v404_v2 = vrot.slane %v396_v62, %v4141_v61  ;;  %v376_v3 = vrot.slane %v368_v0, %v4141_v61 }
  0xa1   : > { %v417_v4 = vmul.bf16 %v404_v2, %v4146_v63  ;;  %v389_v5 = vmul.bf16 %v376_v3, %v4151_v1 }
  0xa2   : > { %v408_v6 = vpop.permute.xlu1 %407  ;;  %v380_v8 = vpop.permute.xlu0 %379 }
  0xa3   : > { %v419_v10 = vadd.bf16 %v417_v4, %v389_v5  ;;  %v416_v11 = vrot.slane %v408_v6, %v4141_v61  ;;  %v388_v12 = vrot.slane %v380_v8, %v4141_v61 }
  0xa5   : > { %v418_v13 = vmul.bf16 %v416_v11, %v4160_v7  ;;  %v390_v14 = vmul.bf16 %v388_v12, %v4165_v9  ;;  %422 = vst.msk [vmem:[#allocation2] sm:$0xf] %vm421_vm0, %v419_v10 }
  0xa7   : > { %v420_v15 = vadd.bf16 %v418_v13, %v390_v14  ;;  %v441_v16 = vpop.permute.xlu1 %440  ;;  %v429_v17 = vpop.permute.xlu0 %428  ;;  %v3738_v14 = vld [vmem:[%s4212_s11 + $0x78] sm:$0xff]  }
  0xa8   : > { %v437_v18 = vrot.slane %v429_v17, %v4141_v61  ;;  %v449_v19 = vrot.slane %v441_v16, %v4141_v61  ;;  %v3739_v16 = vld [vmem:[%s4212_s11 + $0x38] sm:$0xff]   ;;  %3494 = vmatprep.subr.bf16.mxu0 %v3738_v14  ;;  %v3740_v17 = vld [vmem:[%s4212_s11 + $0x70] sm:$0xff]  }
  0xa9   : > { %423 = vst.msk [vmem:[#allocation2 + $0x20] sm:$0xf] %vm421_vm0, %v420_v15  ;;  %3495 = vmatpush3.bf16.msra.mxu0 %v3739_v16 }
  0xaa   : > { %v450_v22 = vmul.bf16 %v437_v18, %v4151_v1  ;;  %v451_v25 = vmul.bf16 %v449_v19, %v4165_v9  ;;  %3496 = vmatprep.subr.bf16.mxu0 %v3740_v17 }
  0xab   : > { %v457_v20 = vpop.permute.xlu1 %456  ;;  %v469_v21 = vpop.permute.xlu0 %468 }
  0xac   : > { %v465_v23 = vrot.slane %v457_v20, %v4141_v61  ;;  %v477_v24 = vrot.slane %v469_v21, %v4141_v61  ;;  %v3741_v20 = vld [vmem:[%s4212_s11 + $0x30] sm:$0xff]  }
  0xad   : > { %3497 = vmatpush3.bf16.msra.mxu0 %v3741_v20 }
  0xae   : > { %v478_v26 = vmul.bf16 %v465_v23, %v4146_v63  ;;  %v479_v27 = vmul.bf16 %v477_v24, %v4160_v7 }
  0xb0   : > { %v498_v28 = vpop.permute.xlu1 %497  ;;  %v481_v29 = vadd.bf16 %v479_v27, %v451_v25  ;;  %v480_v30 = vadd.bf16 %v478_v26, %v450_v22  ;;  %v510_v31 = vpop.permute.xlu0 %509 }
  0xb1   : > { %v506_v32 = vrot.slane %v498_v28, %v4141_v61  ;;  %v518_v35 = vrot.slane %v510_v31, %v4141_v61  ;;  %v3743_v31 = vld [vmem:[%s4212_s11 + $0x28] sm:$0xff]  }
  0xb2   : > { %486 = vrot.lane.b32.xlu0 %v481_v29, %s3892_s7  ;;  %484 = vrot.lane.b32.xlu1 %v480_v30, %s3892_s7  ;;  %v3742_v30 = vld [vmem:[%s4212_s11 + $0x68] sm:$0xff]  }
  0xb3   : > { %v519_v37 = vmul.bf16 %v506_v32, %v4151_v1  ;;  %v520_v40 = vmul.bf16 %v518_v35, %v4165_v9  ;;  %3498 = vmatprep.subr.bf16.mxu0 %v3742_v30  ;;  %v3744_v35 = vld [vmem:[%s4212_s11 + $0x60] sm:$0xff]  }
  0xb4   : > { %v526_v33 = vpop.permute.xlu1 %525  ;;  %3499 = vmatpush3.bf16.msra.mxu0 %v3743_v31 }
  0xb5   : > { %v534_v34 = vrot.slane %v526_v33, %v4141_v61  ;;  %v567_v36 = vpop.permute.xlu0 %566  ;;  %3500 = vmatprep.subr.bf16.mxu0 %v3744_v35 }
  0xb6   : > { %v575_v48 = vrot.slane %v567_v36, %v4141_v61 }
  0xb7   : > { %v547_v38 = vmul.bf16 %v534_v34, %v4146_v63 }
  0xb8   : > { %v538_v39 = vpop.permute.xlu1 %537  ;;  %v588_v54 = vmul.bf16 %v575_v48, %v4151_v1 }
  0xb9   : > { %v546_v41 = vrot.slane %v538_v39, %v4141_v61  ;;  %v549_v42 = vadd.bf16 %v547_v38, %v519_v37  ;;  %v607_v43 = vpop.permute.xlu0 %606  ;;  %v3745_v37 = vld [vmem:[%s4212_s11 + $0x20] sm:$0xff]   ;;  %v3746_v38 = vld [vmem:[%s4212_s11 + $0x58] sm:$0xff]  }
  0xba   : > { %v615_v44 = vrot.slane %v607_v43, %v4141_v61  ;;  %3501 = vmatpush3.bf16.msra.mxu0 %v3745_v37  ;;  %v3747_v43 = vld [vmem:[%s4212_s11 + $0x18] sm:$0xff]  }
  0xbb   : > { %v548_v45 = vmul.bf16 %v546_v41, %v4160_v7  ;;  %553 = vrot.lane.b32.xlu0 %v549_v42, %s3893_s8  ;;  %3502 = vmatprep.subr.bf16.mxu0 %v3746_v38 }
  0xbc   : > { %v617_v50 = vmul.bf16 %v615_v44, %v4160_v7 }
  0xbd   : > { %v579_v46 = vpop.permute.xlu1 %578  ;;  %v550_v47 = vadd.bf16 %v548_v45, %v520_v40 }
  0xbe   : > { %v587_v49 = vrot.slane %v579_v46, %v4141_v61  ;;  %v648_v53 = vpop.permute.xlu0 %647  ;;  %3503 = vmatpush3.bf16.msra.mxu0 %v3747_v43 }
  0xbf   : > { %555 = vrot.lane.b32.xlu1 %v550_v47, %s3893_s8  ;;  %v656_v3 = vrot.slane %v648_v53, %v4141_v61  ;;  %v3748_v47 = vld [vmem:[%s4212_s11 + $0x50] sm:$0xff]  }
  0xc0   : > { %v589_v51 = vmul.bf16 %v587_v49, %v4165_v9  ;;  %3504 = vmatprep.subr.bf16.mxu0 %v3748_v47 }
  0xc1   : > { %v595_v52 = vpop.permute.xlu1 %594  ;;  %v658_v11 = vmul.bf16 %v656_v3, %v4165_v9 }
  0xc2   : > { %v603_v55 = vrot.slane %v595_v52, %v4141_v61  ;;  %v619_v56 = vadd.bf16 %v617_v50, %v589_v51  ;;  %v3749_v52 = vld [vmem:[%s4212_s11 + $0x10] sm:$0xff]  }
  0xc3   : > { %v696_v60 = vpop.permute.xlu0 %695  ;;  %3505 = vmatpush3.bf16.msra.mxu0 %v3749_v52 }
  0xc4   : > { %v616_v57 = vmul.bf16 %v603_v55, %v4146_v63  ;;  %624 = vrot.lane.b32.xlu0 %v619_v56, %s3894_s9  ;;  %v704_v21 = vrot.slane %v696_v60, %v4141_v61  ;;  %v3750_v55 = vld [vmem:[%s4212_s11 + $0x48] sm:$0xff]   ;;  %v3753_v60 = vld [vmem:[%s4212_s11] sm:$0xff]  }
  0xc5   : > { %v3751_v56 = vld [vmem:[%s4212_s11 + $0x8] sm:$0xff]   ;;  %3506 = vmatprep.subr.bf16.mxu0 %v3750_v55  ;;  %v1120_v55 = vld [vmem:[%s5033_s1 + $0x4] sm:$0xf] }
  0xc6   : > { %v636_v58 = vpop.permute.xlu1 %635  ;;  %v618_v59 = vadd.bf16 %v616_v57, %v588_v54  ;;  %v717_v27 = vmul.bf16 %v704_v21, %v4151_v1  ;;  %v3752_v57 = vld [vmem:[%s4212_s11 + $0x40] sm:$0xff]  }
  0xc7   : > { %v644_v62 = vrot.slane %v636_v58, %v4141_v61  ;;  %v736_v6 = vpop.permute.xlu0 %735  ;;  %3507 = vmatpush3.bf16.msra.mxu0 %v3751_v56  ;;  %v1092_v56 = vld [vmem:[%s5032_s0 + $0x4] sm:$0xf] }
  0xc8   : > { %622 = vrot.lane.b32.xlu1 %v618_v59, %s3894_s9  ;;  %v744_v13 = vrot.slane %v736_v6, %v4141_v61  ;;  %3508 = vmatprep.subr.bf16.mxu0 %v3752_v57  ;;  %v1119_v57 = vld [vmem:[%s5033_s1] sm:$0xf] }
  0xc9   : > { %v657_v4 = vmul.bf16 %v644_v62, %v4151_v1 }
  0xca   : > { %v664_v0 = vpop.permute.xlu1 %663  ;;  %v746_v23 = vmul.bf16 %v744_v13, %v4160_v7 }
  0xcb   : > { %v672_v2 = vrot.slane %v664_v0, %v4141_v61  ;;  %3509 = vmatpush3.bf16.msra.mxu0 %v3753_v60 }
  0xcc   : > { %v776_v26 = vpop.permute.xlu0 %775 }
  0xcd   : > { %v685_v5 = vmul.bf16 %v672_v2, %v4146_v63  ;;  %v784_v42 = vrot.slane %v776_v26, %v4141_v61 }
  0xce   : > { %v676_v8 = vpop.permute.xlu1 %675 }
  0xcf   : > { %v687_v10 = vadd.bf16 %v685_v5, %v657_v4  ;;  %v684_v12 = vrot.slane %v676_v8, %v4141_v61  ;;  %v786_v49 = vmul.bf16 %v784_v42, %v4165_v9 }
  0xd1   : > { %v686_v15 = vmul.bf16 %v684_v12, %v4160_v7  ;;  %689 = vst.msk [vmem:[#allocation2 + $0x4] sm:$0xf] %vm421_vm0, %v687_v10  ;;  %v832_v36 = vpop.permute.xlu0 %831 }
  0xd2   : > { %v840_v62 = vrot.slane %v832_v36, %v4141_v61 }
  0xd3   : > { %v688_v18 = vadd.bf16 %v686_v15, %v658_v11  ;;  %v708_v19 = vpop.permute.xlu1 %707 }
  0xd4   : > { %v716_v22 = vrot.slane %v708_v19, %v4141_v61  ;;  %v853_v6 = vmul.bf16 %v840_v62, %v4151_v1 }
  0xd5   : > { %690 = vst.msk [vmem:[#allocation2 + $0x24] sm:$0xf] %vm421_vm0, %v688_v18  ;;  %v872_v46 = vpop.permute.xlu0 %871 }
  0xd6   : > { %v718_v24 = vmul.bf16 %v716_v22, %v4165_v9  ;;  %v880_v53 = vrot.slane %v872_v46, %v4141_v61 }
  0xd7   : > { %v724_v25 = vpop.permute.xlu1 %723 }
  0xd8   : > { %v732_v28 = vrot.slane %v724_v25, %v4141_v61  ;;  %v748_v29 = vadd.bf16 %v746_v23, %v718_v24  ;;  %v882_v2 = vmul.bf16 %v880_v53, %v4160_v7  ;;  %v1091_v53 = vld [vmem:[%s5032_s0] sm:$0xf] }
  0xda   : > { %v745_v32 = vmul.bf16 %v732_v28, %v4146_v63  ;;  %753 = vrot.lane.b32.xlu0 %v748_v29, %s3892_s7  ;;  %v912_v5 = vpop.permute.xlu0 %911 }
  0xdb   : > { %v920_v18 = vrot.slane %v912_v5, %v4141_v61 }
  0xdc   : > { %v764_v33 = vpop.permute.xlu1 %763  ;;  %v747_v34 = vadd.bf16 %v745_v32, %v717_v27 }
  0xdd   : > { %v772_v39 = vrot.slane %v764_v33, %v4141_v61  ;;  %v922_v24 = vmul.bf16 %v920_v18, %v4165_v9 }
  0xde   : > { %751 = vrot.lane.b32.xlu1 %v747_v34, %s3892_s7 }
  0xdf   : > { %v785_v44 = vmul.bf16 %v772_v39, %v4151_v1  ;;  %v960_v14 = vpop.permute.xlu0 %959 }
  0xe0   : > { %v792_v40 = vpop.permute.xlu1 %791  ;;  %v968_v30 = vrot.slane %v960_v14, %v4141_v61 }
  0xe1   : > { %v800_v41 = vrot.slane %v792_v40, %v4141_v61 }
  0xe2   : > { %v981_v35 = vmul.bf16 %v968_v30, %v4151_v1 }
  0xe3   : > { %v813_v45 = vmul.bf16 %v800_v41, %v4146_v63  ;;  %v1000_v21 = vpop.permute.xlu0 %999 }
  0xe4   : > { %v804_v48 = vpop.permute.xlu1 %803  ;;  %v1008_v26 = vrot.slane %v1000_v21, %v4141_v61 }
  0xe5   : > { %v812_v50 = vrot.slane %v804_v48, %v4141_v61  ;;  %v815_v51 = vadd.bf16 %v813_v45, %v785_v44 }
  0xe6   : > { %v1010_v32 = vmul.bf16 %v1008_v26, %v4160_v7 }
  0xe7   : > { %v814_v54 = vmul.bf16 %v812_v50, %v4160_v7  ;;  %819 = vrot.lane.b32.xlu0 %v815_v51, %s3893_s8 }
  0xe8   : > { %v1040_v41 = vpop.permute.xlu0 %1039 }
  0xe9   : > { %v844_v58 = vpop.permute.xlu1 %843  ;;  %v816_v59 = vadd.bf16 %v814_v54, %v786_v49  ;;  %v1048_v45 = vrot.slane %v1040_v41, %v4141_v61  ;;  %v1287_v41 = vld [vmem:[%s5032_s0] sm:$0xf] }
  0xea   : > { %v852_v0 = vrot.slane %v844_v58, %v4141_v61  ;;  %v3895_v58 = vmov 13  }
  0xeb   : > { %821 = vrot.lane.b32.xlu1 %v816_v59, %s3893_s8  ;;  %v1050_v50 = vmul.bf16 %v1048_v45, %v4165_v9  ;;  %v3896_v59 = vmov 12   ;;  %v1316_v45 = vld [vmem:[%s5033_s1 + $0x4] sm:$0xf] }
  0xec   : > { %v854_v3 = vmul.bf16 %v852_v0, %v4165_v9 }
  0xed   : > { %v860_v4 = vpop.permute.xlu1 %859 }
  0xee   : > { %v868_v8 = vrot.slane %v860_v4, %v4141_v61  ;;  %v884_v10 = vadd.bf16 %v882_v2, %v854_v3 }
  0xf0   : > { %v881_v11 = vmul.bf16 %v868_v8, %v4146_v63  ;;  %889 = vrot.lane.b32.xlu0 %v884_v10, %s3894_s9 }
  0xf2   : > { %v900_v12 = vpop.permute.xlu1 %899  ;;  %v883_v13 = vadd.bf16 %v881_v11, %v853_v6 }
  0xf3   : > { %v908_v15 = vrot.slane %v900_v12, %v4141_v61 }
  0xf4   : > { %887 = vrot.lane.b32.xlu1 %v883_v13, %s3894_s9 }
  0xf5   : > { %v921_v19 = vmul.bf16 %v908_v15, %v4151_v1 }
  0xf6   : > { %v928_v16 = vpop.permute.xlu1 %927 }
  0xf7   : > { %v936_v17 = vrot.slane %v928_v16, %v4141_v61 }
  0xf9   : > { %v949_v20 = vmul.bf16 %v936_v17, %v4146_v63 }
  0xfa   : > { %v940_v22 = vpop.permute.xlu1 %939 }
  0xfb   : > { %v951_v23 = vadd.bf16 %v949_v20, %v921_v19  ;;  %v948_v25 = vrot.slane %v940_v22, %v4141_v61 }
  0xfd   : > { %v950_v27 = vmul.bf16 %v948_v25, %v4160_v7  ;;  %953 = vst.msk [vmem:[#allocation2 + $0x8] sm:$0xf] %vm421_vm0, %v951_v23 }
  0xff   : > { %v952_v28 = vadd.bf16 %v950_v27, %v922_v24  ;;  %v972_v29 = vpop.permute.xlu1 %971 }
 0x100   : > { %v980_v31 = vrot.slane %v972_v29, %v4141_v61 }
 0x101   : > { %954 = vst.msk [vmem:[#allocation2 + $0x28] sm:$0xf] %vm421_vm0, %v952_v28 }
 0x102   : > { %v982_v33 = vmul.bf16 %v980_v31, %v4165_v9 }
 0x103   : > { %v988_v34 = vpop.permute.xlu1 %987 }
 0x104   : > { %v996_v36 = vrot.slane %v988_v34, %v4141_v61  ;;  %v1012_v37 = vadd.bf16 %v1010_v32, %v982_v33  ;;  %v1219_v34 = vld [vmem:[%s5032_s0] sm:$0xf] }
 0x106   : > { %v1009_v38 = vmul.bf16 %v996_v36, %v4146_v63  ;;  %1017 = vrot.lane.b32.xlu0 %v1012_v37, %s3892_s7  ;;  %v3897_v36 = vmov 14   ;;  %v1247_v37 = vld [vmem:[%s5033_s1] sm:$0xf] }
 0x108   : > { %v1028_v39 = vpop.permute.xlu1 %1027  ;;  %v1011_v40 = vadd.bf16 %v1009_v38, %v981_v35  ;;  %v1355_v38 = vld [vmem:[%s5032_s0] sm:$0xf] }
 0x109   : > { %v1036_v42 = vrot.slane %v1028_v39, %v4141_v61  ;;  %v3898_v39 = vmov 15  }
 0x10a   : > { %1015 = vrot.lane.b32.xlu1 %v1011_v40, %s3892_s7  ;;  %v1384_v40 = vld [vmem:[%s5033_s1 + $0x4] sm:$0xf] }
 0x10b   : > { %v1049_v46 = vmul.bf16 %v1036_v42, %v4151_v1  ;;  %v1315_v42 = vld [vmem:[%s5033_s1] sm:$0xf] }
 0x10c   : > { %v1056_v43 = vpop.permute.xlu1 %1055 }
 0x10d   : > { %v1064_v44 = vrot.slane %v1056_v43, %v4141_v61  ;;  %v1484_v43 = vld [vmem:[%s5032_s0 + $0x4] sm:$0xf] }
 0x10f   : > { %v1077_v47 = vmul.bf16 %v1064_v44, %v4146_v63  ;;  %v3899_v44 = vmov 17  }
 0x110   : > { %v1068_v48 = vpop.permute.xlu1 %1067 }
 0x111   : > { %v1076_v49 = vrot.slane %v1068_v48, %v4141_v61  ;;  %v1079_v51 = vadd.bf16 %v1077_v47, %v1049_v46  ;;  %v1747_v46 = vld [vmem:[%s5032_s0] sm:$0xf]  ;;  %v3900_v47 = vmov 21   ;;  %v1356_v48 = vld [vmem:[%s5032_s0 + $0x4] sm:$0xf] }
 0x113   : > { %v1078_v52 = vmul.bf16 %v1076_v49, %v4160_v7  ;;  %1083 = vrot.lane.b32.xlu0 %v1079_v51, %s3893_s8  ;;  %v1776_v49 = vld [vmem:[%s5033_s1 + $0x4] sm:$0xf] }
 0x114   : > { %v1552_v51 = vld [vmem:[%s5032_s0 + $0x4] sm:$0xf] }
 0x115   : > { %v1080_v54 = vadd.bf16 %v1078_v52, %v1050_v50  ;;  %v1383_v50 = vld [vmem:[%s5033_s1] sm:$0xf]  ;;  %v3901_v52 = vmov 18  }
 0x117   : > { %1095 = vperm.xlu0 %3694, %v1091_v53   ;;  %1085 = vrot.lane.b32.xlu1 %v1080_v54, %s3893_s8  ;;  %v1483_v53 = vld [vmem:[%s5032_s0] sm:$0xf] }
 0x118   : > { %v1815_v54 = vld [vmem:[%s5032_s0] sm:$0xf] }
 0x11b   : > { %1135 = vperm.xlu0 %3694, %v1120_v55   ;;  %1107 = vperm.xlu1 %3695, %v1092_v56   ;;  %v3902_v55 = vmov 22   ;;  %v1511_v56 = vld [vmem:[%s5033_s1] sm:$0xf] }
 0x11f   : > { %1123 = vperm.xlu1 %3695, %v1119_v57   ;;  %3697 = vset.pattern.permute.xlu0 %v3895_v58  ;;  %v1844_v57 = vld [vmem:[%s5033_s1 + $0x4] sm:$0xf] }
 0x123   : > { %3696 = vset.pattern.permute.xlu1 %v3896_v59 }
 0x124   : > { %v487_v60 = vpop.permute.xlu0 %486  ;;  %v485_v62 = vpop.permute.xlu1 %484 }
 0x125   : > { %492 = vst.msk [vmem:[#allocation2 + $0x20] sm:$0xf] %vm490_vm1, %v487_v60  ;;  %491 = vst.msk [vmem:[#allocation2] sm:$0xf] %vm490_vm1, %v485_v62  ;;  %v1620_v60 = vld [vmem:[%s5032_s0 + $0x4] sm:$0xf] }
 0x126   : > { %v3903_v62 = vmov 19  }
 0x12d   : > { %v554_v0 = vpop.permute.xlu0 %553 }
 0x12e   : > { %560 = vst.msk [vmem:[#allocation2] sm:$0xf] %vm559_vm2, %v554_v0  ;;  %v1748_v0 = vld [vmem:[%s5032_s0 + $0x4] sm:$0xf] }
 0x131   : > { %v556_v2 = vpop.permute.xlu1 %555 }
 0x132   : > { %561 = vst.msk [vmem:[#allocation2 + $0x20] sm:$0xf] %vm559_vm2, %v556_v2  ;;  %v1883_v2 = vld [vmem:[%s5032_s0] sm:$0xf] }
 0x136   : > { %v625_v3 = vpop.permute.xlu0 %624 }
 0x137   : > { %630 = vst.msk [vmem:[#allocation2 + $0x20] sm:$0xf] %vm628_vm3, %v625_v3  ;;  %v1775_v3 = vld [vmem:[%s5033_s1] sm:$0xf] }
 0x13a   : > { %v623_v4 = vpop.permute.xlu1 %622 }
 0x13b   : > { %629 = vst.msk [vmem:[#allocation2] sm:$0xf] %vm628_vm3, %v623_v4  ;;  %v3904_v4 = vmov 23  }
 0x14c   : > { %v754_v5 = vpop.permute.xlu0 %753 }
 0x14d   : > { %758 = vst.msk [vmem:[#allocation2 + $0x24] sm:$0xf] %vm490_vm1, %v754_v5  ;;  %v1912_v5 = vld [vmem:[%s5033_s1 + $0x4] sm:$0xf] }
 0x150   : > { %v752_v6 = vpop.permute.xlu1 %751 }
 0x151   : > { %757 = vst.msk [vmem:[#allocation2 + $0x4] sm:$0xf] %vm490_vm1, %v752_v6  ;;  %v1551_v6 = vld [vmem:[%s5032_s0] sm:$0xf] }
 0x159   : > { %v820_v8 = vpop.permute.xlu0 %819 }
 0x15a   : > { %825 = vst.msk [vmem:[#allocation2 + $0x4] sm:$0xf] %vm559_vm2, %v820_v8  ;;  %v2012_v8 = vld [vmem:[%s5032_s0 + $0x4] sm:$0xf] }
 0x15d   : > { %v822_v10 = vpop.permute.xlu1 %821 }
 0x15e   : > { %826 = vst.msk [vmem:[#allocation2 + $0x24] sm:$0xf] %vm559_vm2, %v822_v10  ;;  %v1579_v10 = vld [vmem:[%s5033_s1] sm:$0xf] }
 0x162   : > { %v890_v11 = vpop.permute.xlu0 %889 }
 0x163   : > { %894 = vst.msk [vmem:[#allocation2 + $0x24] sm:$0xf] %vm628_vm3, %v890_v11  ;;  %v3905_v11 = vmov 25  }
 0x166   : > { %v888_v12 = vpop.permute.xlu1 %887 }
 0x167   : > { %893 = vst.msk [vmem:[#allocation2 + $0x4] sm:$0xf] %vm628_vm3, %v888_v12  ;;  %v2275_v12 = vld [vmem:[%s5032_s0] sm:$0xf] }
 0x16a   : > { %v2618_v14 = vld [vmem:[#allocation2 + $0x20] sm:$0xff] }
 0x16e   : > { %v2614_v13 = vld [vmem:[#allocation2] sm:$0xff] }
 0x16f   : > { %v3417_v15 = vcombine.low %v2614_v13, %v2618_v14  ;;  %v3418_v16 = vcombine.high %v2614_v13, %v2618_v14  ;;  %v1580_v13 = vld [vmem:[%s5033_s1 + $0x4] sm:$0xf]  ;;  %v3906_v14 = vmov 29  }
 0x171   : > { %3078 = vmatprep.mubr.bf16.mxu0 %v3418_v16  ;;  %v1816_v16 = vld [vmem:[%s5032_s0 + $0x4] sm:$0xf] }
 0x172   : > { %3079 = vmatmul.mubr.bf16.vlgmr.msra.gmra.mxu0 %v3417_v15  ;;  %v2304_v15 = vld [vmem:[%s5033_s1 + $0x4] sm:$0xf] }
 0x178   : > { %v1018_v17 = vpop.permute.xlu0 %1017 }
 0x179   : > { %1022 = vst.msk [vmem:[#allocation2 + $0x28] sm:$0xf] %vm490_vm1, %v1018_v17  ;;  %v2080_v17 = vld [vmem:[%s5032_s0 + $0x4] sm:$0xf] }
 0x17c   : > { %v1016_v18 = vpop.permute.xlu1 %1015 }
 0x17d   : > { %1021 = vst.msk [vmem:[#allocation2 + $0x8] sm:$0xf] %vm490_vm1, %v1016_v18  ;;  %v1843_v18 = vld [vmem:[%s5033_s1] sm:$0xf] }
 0x185   : > { %v1084_v19 = vpop.permute.xlu0 %1083 }
 0x186   : > { %1089 = vst.msk [vmem:[#allocation2 + $0x8] sm:$0xf] %vm559_vm2, %v1084_v19  ;;  %v3907_v19 = vmov 26  }
 0x189   : > { %v1086_v20 = vpop.permute.xlu1 %1085 }
 0x18a   : > { %1090 = vst.msk [vmem:[#allocation2 + $0x28] sm:$0xf] %vm559_vm2, %v1086_v20  ;;  %v2343_v20 = vld [vmem:[%s5032_s0] sm:$0xf] }
 0x192   : > { %v1096_v21 = vpop.permute.xlu0 %1095 }
 0x193   : > { %v1104_v24 = vrot.slane %v1096_v21, %v4141_v61  ;;  %v1619_v21 = vld [vmem:[%s5032_s0] sm:$0xf] }
 0x195   : > { %v1117_v30 = vmul.bf16 %v1104_v24, %v4151_v1  ;;  %v1159_v1 = vld [vmem:[%s5032_s0] sm:$0xf] }
 0x196   : > { %v1136_v22 = vpop.permute.xlu0 %1135  ;;  %v1108_v23 = vpop.permute.xlu1 %1107  ;;  %v1647_v24 = vld [vmem:[%s5033_s1] sm:$0xf] }
 0x197   : > { %v1144_v25 = vrot.slane %v1136_v22, %v4141_v61  ;;  %v1116_v26 = vrot.slane %v1108_v23, %v4141_v61  ;;  %v3908_v22 = vmov 30   ;;  %v2372_v23 = vld [vmem:[%s5033_s1 + $0x4] sm:$0xf] }
 0x199   : > { %v1146_v27 = vmul.bf16 %v1144_v25, %v4160_v7  ;;  %v1118_v28 = vmul.bf16 %v1116_v26, %v4165_v9  ;;  %v1248_v7 = vld [vmem:[%s5033_s1 + $0x4] sm:$0xf] }
 0x19a   : > { %v1124_v29 = vpop.permute.xlu1 %1123  ;;  %v1220_v9 = vld [vmem:[%s5032_s0 + $0x4] sm:$0xf] }
 0x19b   : > { %v1132_v31 = vrot.slane %v1124_v29, %v4141_v61  ;;  %v1148_v32 = vadd.bf16 %v1146_v27, %v1118_v28  ;;  %v1648_v25 = vld [vmem:[%s5033_s1 + $0x4] sm:$0xf]  ;;  %v3909_v27 = vmov 27   ;;  %v2411_v29 = vld [vmem:[%s5032_s0] sm:$0xf] }
 0x19c   : > { %v2148_v26 = vld [vmem:[%s5032_s0 + $0x4] sm:$0xf] }
 0x19d   : > { %v1145_v33 = vmul.bf16 %v1132_v31, %v4146_v63  ;;  %1153 = vrot.lane.b32.xlu0 %v1148_v32, %s3894_s9  ;;  %v1288_v63 = vld [vmem:[%s5032_s0 + $0x4] sm:$0xf]  ;;  %v1911_v31 = vld [vmem:[%s5033_s1] sm:$0xf] }
 0x19e   : > { %v1884_v28 = vld [vmem:[%s5032_s0 + $0x4] sm:$0xf] }
 0x19f   : > { %v1147_v35 = vadd.bf16 %v1145_v33, %v1117_v30  ;;  %v3910_v30 = vmov 31   ;;  %v2440_v32 = vld [vmem:[%s5033_s1 + $0x4] sm:$0xf]  ;;  %v2011_v33 = vld [vmem:[%s5032_s0] sm:$0xf] }
 0x1a1   : > { %1223 = vperm.xlu0 %3697, %v1219_v34   ;;  %1151 = vrot.lane.b32.xlu1 %v1147_v35, %s3894_s9  ;;  %v1187_v34 = vld [vmem:[%s5033_s1] sm:$0xf] }
 0x1a2   : > { %v2039_v35 = vld [vmem:[%s5033_s1] sm:$0xf] }
 0x1a5   : > { %1263 = vperm.xlu0 %3697, %v1248_v7   ;;  %1163 = vperm.xlu1 %3696, %v1159_v1   ;;  %v2040_v1 = vld [vmem:[%s5033_s1 + $0x4] sm:$0xf] }
 0x1a9   : > { %3700 = vset.pattern.permute.xlu0 %v3897_v36  ;;  %3698 = vset.pattern.permute.xlu1 %v3895_v58  ;;  %v1512_v58 = vld [vmem:[%s5033_s1 + $0x4] sm:$0xf] }
 0x1aa   : > { %1303 = vperm.xlu0 %3700, %v1288_v63   ;;  %1235 = vperm.xlu1 %3698, %v1220_v9   ;;  %v3911_v63 = vmov 16  }
 0x1ae   : > { %3701 = vset.pattern.permute.xlu0 %v3898_v39  ;;  %1251 = vperm.xlu1 %3698, %v1247_v37   ;;  %v2303_v37 = vld [vmem:[%s5033_s1] sm:$0xf] }
 0x1af   : > { %1359 = vperm.xlu0 %3701, %v1355_v38  }
 0x1b2   : > { %3699 = vset.pattern.permute.xlu1 %v3897_v36  ;;  %v2276_v36 = vld [vmem:[%s5032_s0 + $0x4] sm:$0xf] }
 0x1b3   : > { %1399 = vperm.xlu0 %3701, %v1384_v40   ;;  %1291 = vperm.xlu1 %3699, %v1287_v41  }
 0x1b7   : > { %3704 = vset.pattern.permute.xlu0 %v3899_v44  ;;  %1319 = vperm.xlu1 %3699, %v1315_v42  }
 0x1b8   : > { %1499 = vperm.xlu0 %3704, %v1484_v43   ;;  %v2107_v43 = vld [vmem:[%s5033_s1] sm:$0xf] }
 0x1bb   : > { %1331 = vperm.xlu1 %3699, %v1316_v45  }
 0x1bc   : > { %3705 = vset.pattern.permute.xlu0 %v3900_v47 }
 0x1bd   : > { %1751 = vperm.xlu0 %3705, %v1747_v46   ;;  %v4510_v46 = vld [vmem:[%s5035_s3 + $0x4] sm:$0xf] }
 0x1bf   : > { %3702 = vset.pattern.permute.xlu1 %v3898_v39  ;;  %v2079_v39 = vld [vmem:[%s5032_s0] sm:$0xf] }
 0x1c0   : > { %1371 = vperm.xlu1 %3702, %v1356_v48  }
 0x1c1   : > { %1791 = vperm.xlu0 %3705, %v1776_v49   ;;  %v2108_v49 = vld [vmem:[%s5033_s1 + $0x4] sm:$0xf] }
 0x1c4   : > { %1387 = vperm.xlu1 %3702, %v1383_v50   ;;  %v4520_v50 = vld [vmem:[%s5034_s2 + $0x4] sm:$0xf] }
 0x1c5   : > { %3708 = vset.pattern.permute.xlu0 %v3901_v52 }
 0x1c6   : > { %1567 = vperm.xlu0 %3708, %v1552_v51  }
 0x1c8   : > { %3703 = vset.pattern.permute.xlu1 %v3899_v44 }
 0x1c9   : > { %1487 = vperm.xlu1 %3703, %v1483_v53  }
 0x1ca   : > { %3709 = vset.pattern.permute.xlu0 %v3902_v55 }
 0x1cb   : > { %1819 = vperm.xlu0 %3709, %v1815_v54  }
 0x1cd   : > { %1515 = vperm.xlu1 %3703, %v1511_v56  }
 0x1cf   : > { %1859 = vperm.xlu0 %3709, %v1844_v57  }
 0x1d1   : > { %1527 = vperm.xlu1 %3703, %v1512_v58   ;;  %v2371_v58 = vld [vmem:[%s5033_s1] sm:$0xf] }
 0x1d3   : > { %3712 = vset.pattern.permute.xlu0 %v3903_v62 }
 0x1d4   : > { %1635 = vperm.xlu0 %3712, %v1620_v60  }
 0x1d5   : > { %3706 = vset.pattern.permute.xlu1 %v3900_v47 }
 0x1d6   : > { %1763 = vperm.xlu1 %3706, %v1748_v0  }
 0x1d8   : > { %3713 = vset.pattern.permute.xlu0 %v3904_v4 }
 0x1d9   : > { %1887 = vperm.xlu0 %3713, %v1883_v2   ;;  %v2147_v2 = vld [vmem:[%s5032_s0] sm:$0xf] }
 0x1da   : > { %1779 = vperm.xlu1 %3706, %v1775_v3  }
 0x1dd   : > { %1927 = vperm.xlu0 %3713, %v1912_v5  }
 0x1de   : > { %3707 = vset.pattern.permute.xlu1 %v3901_v52 }
 0x1df   : > { %1555 = vperm.xlu1 %3707, %v1551_v6  }
 0x1e1   : > { %3716 = vset.pattern.permute.xlu0 %v3905_v11 }
 0x1e2   : > { %2027 = vperm.xlu0 %3716, %v2012_v8   ;;  %v2175_v8 = vld [vmem:[%s5033_s1] sm:$0xf] }
 0x1e3   : > { %1583 = vperm.xlu1 %3707, %v1579_v10  }
 0x1e6   : > { %3717 = vset.pattern.permute.xlu0 %v3906_v14 }
 0x1e7   : > { %2279 = vperm.xlu0 %3717, %v2275_v12   ;;  %1595 = vperm.xlu1 %3707, %v1580_v13  }
 0x1eb   : > { %2319 = vperm.xlu0 %3717, %v2304_v15   ;;  %3710 = vset.pattern.permute.xlu1 %v3902_v55  ;;  %v2344_v55 = vld [vmem:[%s5032_s0 + $0x4] sm:$0xf] }
 0x1ec   : > { %1831 = vperm.xlu1 %3710, %v1816_v16   ;;  %v2176_v16 = vld [vmem:[%s5033_s1 + $0x4] sm:$0xf] }
 0x1ef   : > { %3720 = vset.pattern.permute.xlu0 %v3907_v19 }
 0x1f0   : > { %2095 = vperm.xlu0 %3720, %v2080_v17   ;;  %1847 = vperm.xlu1 %3710, %v1843_v18  }
 0x1f4   : > { %3721 = vset.pattern.permute.xlu0 %v3908_v22  ;;  %3711 = vset.pattern.permute.xlu1 %v3903_v62 }
 0x1f5   : > { %2347 = vperm.xlu0 %3721, %v2343_v20   ;;  %1623 = vperm.xlu1 %3711, %v1619_v21   ;;  %v2412_v21 = vld [vmem:[%s5032_s0 + $0x4] sm:$0xf] }
 0x1f9   : > { %2387 = vperm.xlu0 %3721, %v2372_v23   ;;  %1651 = vperm.xlu1 %3711, %v1647_v24   ;;  %v3754_v23 = vld [vmem:[%s4212_s11 + $0xf8] sm:$0xff]   ;;  %v1424_v24 = vld [vmem:[%s5032_s0 + $0x4] sm:$0xf] }
 0x1fa   : > { %3516 = vmatprep.subr.bf16.mxu1 %v3754_v23 }
 0x1fd   : > { %3724 = vset.pattern.permute.xlu0 %v3909_v27  ;;  %1663 = vperm.xlu1 %3711, %v1648_v25   ;;  %v3755_v25 = vld [vmem:[%s4212_s11 + $0xb8] sm:$0xff]  }
 0x1fe   : > { %2163 = vperm.xlu0 %3724, %v2148_v26   ;;  %3517 = vmatpush3.bf16.msra.mxu1 %v3755_v25 }
 0x201   : > { %3714 = vset.pattern.permute.xlu1 %v3904_v4 }
 0x202   : > { %3725 = vset.pattern.permute.xlu0 %v3910_v30  ;;  %1899 = vperm.xlu1 %3714, %v1884_v28  }
 0x203   : > { %2415 = vperm.xlu0 %3725, %v2411_v29   ;;  %v3756_v29 = vld [vmem:[%s4212_s11 + $0xf0] sm:$0xff]  }
 0x204   : > { %3518 = vmatprep.subr.bf16.mxu1 %v3756_v29 }
 0x206   : > { %1915 = vperm.xlu1 %3714, %v1911_v31   ;;  %v3757_v31 = vld [vmem:[%s4212_s11 + $0xb0] sm:$0xff]  }
 0x207   : > { %2455 = vperm.xlu0 %3725, %v2440_v32   ;;  %3519 = vmatpush3.bf16.msra.mxu1 %v3757_v31 }
 0x20a   : > { %3715 = vset.pattern.permute.xlu1 %v3905_v11 }
 0x20b   : > { %3728 = vset.pattern.permute.xlu0 %v3896_v59  ;;  %2015 = vperm.xlu1 %3715, %v2011_v33   ;;  %v1687_v33 = vld [vmem:[%s5032_s0] sm:$0xf] }
 0x20c   : > { %1191 = vperm.xlu0 %3728, %v1187_v34   ;;  %v3912_v34 = vmov 20  }
 0x20f   : > { %v1154_v7 = vpop.permute.xlu0 %1153  ;;  %2043 = vperm.xlu1 %3715, %v2039_v35   ;;  %v1160_v35 = vld [vmem:[%s5032_s0 + $0x4] sm:$0xf] }
 0x210   : > { %1158 = vst.msk [vmem:[#allocation2 + $0x28] sm:$0xf] %vm628_vm3, %v1154_v7  ;;  %3730 = vset.pattern.permute.xlu0 %v3911_v63 }
 0x213   : > { %2055 = vperm.xlu1 %3715, %v2040_v1   ;;  %v1152_v9 = vpop.permute.xlu1 %1151  ;;  %v3758_v1 = vld [vmem:[%s4212_s11 + $0xe8] sm:$0xff]  }
 0x214   : > { %1157 = vst.msk [vmem:[#allocation2 + $0x8] sm:$0xf] %vm628_vm3, %v1152_v9  ;;  %3520 = vmatprep.subr.bf16.mxu1 %v3758_v1 }
 0x217   : > { %3718 = vset.pattern.permute.xlu1 %v3906_v14 }
 0x218   : > { %2291 = vperm.xlu1 %3718, %v2276_v36  }
 0x21c   : > { %2307 = vperm.xlu1 %3718, %v2303_v37   ;;  %v4496_v38 = vpop.permute.xlu0 %1223  ;;  %v3759_v37 = vld [vmem:[%s4212_s11 + $0xa8] sm:$0xff]  }
 0x21d   : > { %v1232_v9 = vrot.slane %v4496_v38, %v4141_v61  ;;  %3521 = vmatpush3.bf16.msra.mxu1 %v3759_v37  ;;  %v1188_v38 = vld [vmem:[%s5033_s1 + $0x4] sm:$0xf] }
 0x21e   : > { %v3769_v37 = vld [vmem:[%s4212_s11 + $0x80] sm:$0xff]  }
 0x220   : > { %3719 = vset.pattern.permute.xlu1 %v3907_v19  ;;  %v4501_v40 = vpop.permute.xlu1 %1163  ;;  %v1264_v41 = vpop.permute.xlu0 %1263 }
 0x221   : > { %2083 = vperm.xlu1 %3719, %v2079_v39   ;;  %v1272_v42 = vrot.slane %v1264_v41, %v4141_v61  ;;  %v1716_v41 = vld [vmem:[%s5033_s1 + $0x4] sm:$0xf] }
 0x223   : > { %v1274_v47 = vmul.bf16 %v4510_v46, %v1272_v42  ;;  %v3760_v42 = vld [vmem:[%s4212_s11 + $0xe0] sm:$0xff]  }
 0x224   : > { %3522 = vmatprep.subr.bf16.mxu1 %v3760_v42 }
 0x225   : > { %2111 = vperm.xlu1 %3719, %v2107_v43   ;;  %v1236_v44 = vpop.permute.xlu1 %1235  ;;  %v1304_v45 = vpop.permute.xlu0 %1303  ;;  %v4615_v43 = vld [vmem:[%s5034_s2] sm:$0xf] }
 0x226   : > { %v1244_v48 = vrot.slane %v1236_v44, %v4141_v61  ;;  %v1312_v62 = vrot.slane %v1304_v45, %v4141_v61  ;;  %v4621_v44 = vld [vmem:[%s5035_s3] sm:$0xf] }
 0x228   : > { %v1246_v51 = vmul.bf16 %v4520_v50, %v1244_v48  ;;  %v1314_v4 = vmul.bf16 %v4520_v50, %v1312_v62 }
 0x229   : > { %2123 = vperm.xlu1 %3719, %v2108_v49   ;;  %v4523_v52 = vpop.permute.xlu1 %1251  ;;  %v3761_v49 = vld [vmem:[%s4212_s11 + $0xa0] sm:$0xff]  }
 0x22a   : > { %v1276_v53 = vadd.bf16 %v1274_v47, %v1246_v51  ;;  %v4525_v54 = vpop.permute.xlu0 %1359  ;;  %v1260_v36 = vrot.slane %v4523_v52, %v4141_v61  ;;  %3523 = vmatpush3.bf16.msra.mxu1 %v3761_v49  ;;  %v1452_v49 = vld [vmem:[%s5033_s1 + $0x4] sm:$0xf] }
 0x22c   : > { %1281 = vrot.lane.b32.xlu0 %v1276_v53, %s3892_s7  ;;  %v1273_v45 = vmul.bf16 %v4621_v44, %v1260_v36  ;;  %v1952_v53 = vld [vmem:[%s5032_s0 + $0x4] sm:$0xf] }
 0x22d   : > { %3722 = vset.pattern.permute.xlu1 %v3908_v22 }
 0x22e   : > { %2359 = vperm.xlu1 %3722, %v2344_v55   ;;  %v4532_v56 = vpop.permute.xlu1 %1291  ;;  %v1400_v57 = vpop.permute.xlu0 %1399  ;;  %v3762_v55 = vld [vmem:[%s4212_s11 + $0xd8] sm:$0xff]  }
 0x22f   : > { %v1408_v6 = vrot.slane %v1400_v57, %v4141_v61  ;;  %v1300_v51 = vrot.slane %v4532_v56, %v4141_v61  ;;  %v3763_v56 = vld [vmem:[%s4212_s11 + $0x98] sm:$0xff]   ;;  %3524 = vmatprep.subr.bf16.mxu1 %v3762_v55 }
 0x230   : > { %3525 = vmatpush3.bf16.msra.mxu1 %v3763_v56  ;;  %v1715_v56 = vld [vmem:[%s5033_s1] sm:$0xf] }
 0x231   : > { %v1410_v14 = vmul.bf16 %v4510_v46, %v1408_v6  ;;  %v2215_v6 = vld [vmem:[%s5032_s0] sm:$0xf] }
 0x232   : > { %2375 = vperm.xlu1 %3722, %v2371_v58   ;;  %v4537_v60 = vpop.permute.xlu1 %1319 }
 0x233   : > { %v4540_v0 = vpop.permute.xlu0 %1499  ;;  %v1328_v47 = vrot.slane %v4537_v60, %v4141_v61  ;;  %v1368_v60 = vrot.slane %v4525_v54, %v4141_v61 }
 0x234   : > { %v1508_v54 = vrot.slane %v4540_v0, %v4141_v61 }
 0x235   : > { %v1341_v58 = vmul.bf16 %v4621_v44, %v1328_v47 }
 0x236   : > { %3723 = vset.pattern.permute.xlu1 %v3909_v27  ;;  %v1332_v3 = vpop.permute.xlu1 %1331  ;;  %v2439_v27 = vld [vmem:[%s5033_s1] sm:$0xf] }
 0x237   : > { %v1340_v5 = vrot.slane %v1332_v3, %v4141_v61  ;;  %2151 = vperm.xlu1 %3723, %v2147_v2   ;;  %v3913_v2 = vmov 24  }
 0x238   : > { %v4552_v10 = vpop.permute.xlu0 %1751 }
 0x239   : > { %v1342_v11 = vmul.bf16 %v4510_v46, %v1340_v5 }
 0x23b   : > { %v1344_v12 = vadd.bf16 %v1342_v11, %v1314_v4  ;;  %2179 = vperm.xlu1 %3723, %v2175_v8   ;;  %v1372_v13 = vpop.permute.xlu1 %1371  ;;  %v1313_v4 = vmul.bf16 %v4615_v43, %v1300_v51  ;;  %v3764_v8 = vld [vmem:[%s4212_s11 + $0xd0] sm:$0xff]  }
 0x23c   : > { %v1380_v15 = vrot.slane %v1372_v13, %v4141_v61  ;;  %v4560_v17 = vpop.permute.xlu0 %1791  ;;  %3526 = vmatprep.subr.bf16.mxu1 %v3764_v8 }
 0x23d   : > { %1349 = vrot.lane.b32.xlu0 %v1344_v12, %s3893_s8  ;;  %v1343_v11 = vadd.bf16 %v1341_v58, %v1313_v4  ;;  %v1381_v12 = vmul.bf16 %v4615_v43, %v1368_v60  ;;  %v1800_v23 = vrot.slane %v4560_v17, %v4141_v61  ;;  %v3768_v17 = vld [vmem:[%s4212_s11 + $0xc0] sm:$0xff]  }
 0x23e   : > { %v1382_v18 = vmul.bf16 %v4520_v50, %v1380_v15  ;;  %v3765_v15 = vld [vmem:[%s4212_s11 + $0x90] sm:$0xff]   ;;  %v1688_v58 = vld [vmem:[%s5032_s0 + $0x4] sm:$0xf] }
 0x23f   : > { %2191 = vperm.xlu1 %3723, %v2176_v16   ;;  %v4564_v19 = vpop.permute.xlu1 %1387  ;;  %v3914_v16 = vmov 28   ;;  %3527 = vmatpush3.bf16.msra.mxu1 %v3765_v15 }
 0x240   : > { %v1412_v20 = vadd.bf16 %v1410_v14, %v1382_v18  ;;  %v1396_v62 = vrot.slane %v4564_v19, %v4141_v61  ;;  %v2244_v19 = vld [vmem:[%s5033_s1 + $0x4] sm:$0xf] }
 0x241   : > { %v4569_v22 = vpop.permute.xlu0 %1567 }
 0x242   : > { %1417 = vrot.lane.b32.xlu0 %v1412_v20, %s3894_s9  ;;  %v1409_v13 = vmul.bf16 %v4621_v44, %v1396_v62  ;;  %v3766_v20 = vld [vmem:[%s4212_s11 + $0xc8] sm:$0xff]   ;;  %v1576_v1 = vrot.slane %v4569_v22, %v4141_v61 }
 0x243   : > { %3726 = vset.pattern.permute.xlu1 %v3910_v30  ;;  %3528 = vmatprep.subr.bf16.mxu1 %v3766_v20 }
 0x244   : > { %2427 = vperm.xlu1 %3726, %v2412_v21   ;;  %v4578_v26 = vpop.permute.xlu1 %1487  ;;  %v1411_v21 = vadd.bf16 %v1409_v13, %v1381_v12  ;;  %v1578_v22 = vmul.bf16 %v4520_v50, %v1576_v1  ;;  %v1979_v13 = vld [vmem:[%s5033_s1] sm:$0xf] }
 0x246   : > { %1439 = vperm.xlu0 %3730, %v1424_v24   ;;  %v4583_v28 = vpop.permute.xlu0 %1819 }
 0x248   : > { %2443 = vperm.xlu1 %3726, %v2439_v27   ;;  %v4587_v32 = vpop.permute.xlu1 %1515  ;;  %v3767_v27 = vld [vmem:[%s4212_s11 + $0x88] sm:$0xff]  }
 0x249   : > { %3529 = vmatpush3.bf16.msra.mxu1 %v3767_v27 }
 0x24a   : > { %3731 = vset.pattern.permute.xlu0 %v3912_v34  ;;  %v4596_v7 = vpop.permute.xlu0 %1859  ;;  %3530 = vmatprep.subr.bf16.mxu1 %v3768_v17  ;;  %v1524_v17 = vrot.slane %v4587_v32, %v4141_v61  ;;  %v2243_v32 = vld [vmem:[%s5033_s1] sm:$0xf] }
 0x24b   : > { %1691 = vperm.xlu0 %3731, %v1687_v33   ;;  %v1423_v33 = vld [vmem:[%s5032_s0] sm:$0xf] }
 0x24c   : > { %3727 = vset.pattern.permute.xlu1 %v3896_v59  ;;  %v1528_v39 = vpop.permute.xlu1 %1527  ;;  %v1245_v59 = vmul.bf16 %v4615_v43, %v1232_v9 }
 0x24d   : > { %1175 = vperm.xlu1 %3727, %v1160_v35   ;;  %v1536_v14 = vrot.slane %v1528_v39, %v4141_v61  ;;  %v1802_v35 = vmul.bf16 %v4510_v46, %v1800_v23  ;;  %3531 = vmatpush3.bf16.msra.mxu1 %v3769_v37  ;;  %v1760_v37 = vrot.slane %v4552_v10, %v4141_v61 }
 0x24e   : > { %v1275_v57 = vadd.bf16 %v1273_v45, %v1245_v59  ;;  %v1868_v45 = vrot.slane %v4596_v7, %v4141_v61 }
 0x24f   : > { %1731 = vperm.xlu0 %3731, %v1716_v41   ;;  %v4626_v48 = vpop.permute.xlu0 %1635  ;;  %v1538_v24 = vmul.bf16 %v4510_v46, %v1536_v14  ;;  %v1451_v41 = vld [vmem:[%s5033_s1] sm:$0xf] }
 0x251   : > { %1203 = vperm.xlu1 %3727, %v1188_v38   ;;  %v1764_v52 = vpop.permute.xlu1 %1763 }
 0x252   : > { %v1772_v25 = vrot.slane %v1764_v52, %v4141_v61 }
 0x253   : > { %3734 = vset.pattern.permute.xlu0 %v3913_v2 }
 0x254   : > { %1967 = vperm.xlu0 %3734, %v1952_v53   ;;  %v4642_v3 = vpop.permute.xlu0 %1887  ;;  %v1774_v36 = vmul.bf16 %v4520_v50, %v1772_v25  ;;  %v1870_v53 = vmul.bf16 %v4510_v46, %v1868_v45  ;;  %v1773_v45 = vmul.bf16 %v4615_v43, %v1760_v37 }
 0x255   : > { %1279 = vrot.lane.b32.xlu1 %v1275_v57, %s3892_s7  ;;  %v4646_v5 = vpop.permute.xlu1 %1779 }
 0x256   : > { %3729 = vset.pattern.permute.xlu1 %v3911_v63  ;;  %v1510_v63 = vmul.bf16 %v4520_v50, %v1508_v54  ;;  %v1804_v42 = vadd.bf16 %v1802_v35, %v1774_v36  ;;  %v1172_v36 = vrot.slane %v4501_v40, %v4141_v61 }
 0x258   : > { %3735 = vset.pattern.permute.xlu0 %v3914_v16  ;;  %v4660_v0 = vpop.permute.xlu0 %1927  ;;  %v1540_v9 = vadd.bf16 %v1538_v24, %v1510_v63 }
 0x259   : > { %1347 = vrot.lane.b32.xlu1 %v1343_v11, %s3893_s8  ;;  %2219 = vperm.xlu0 %3735, %v2215_v6   ;;  %v1644_v11 = vrot.slane %v4626_v48, %v4141_v61  ;;  %v1980_v48 = vld [vmem:[%s5033_s1 + $0x4] sm:$0xf] }
 0x25a   : > { %v4664_v18 = vpop.permute.xlu1 %1555 }
 0x25b   : > { %v1646_v14 = vmul.bf16 %v4520_v50, %v1644_v11 }
 0x25d   : > { %2259 = vperm.xlu0 %3735, %v2244_v19   ;;  %1415 = vrot.lane.b32.xlu1 %v1411_v21, %s3894_s9  ;;  %v4676_v29 = vpop.permute.xlu0 %2027  ;;  %v1936_v19 = vrot.slane %v4660_v0, %v4141_v61 }
 0x25e   : > { %v4678_v31 = vpop.permute.xlu1 %1583 }
 0x25f   : > { %v1938_v23 = vmul.bf16 %v4510_v46, %v1936_v19  ;;  %v3776_v19 = vld [vmem:[%s4212_s11 + $0x160] sm:$0xff]  }
 0x261   : > { %1427 = vperm.xlu1 %3729, %v1423_v33   ;;  %1545 = vrot.lane.b32.xlu0 %v1540_v9, %s3892_s7  ;;  %v2216_v33 = vld [vmem:[%s5032_s0 + $0x4] sm:$0xf]  ;;  %v1496_v9 = vrot.slane %v4578_v26, %v4141_v61  ;;  %v1788_v26 = vrot.slane %v4646_v5, %v4141_v61 }
 0x262   : > { %v1596_v39 = vpop.permute.xlu1 %1595  ;;  %v4693_v38 = vpop.permute.xlu0 %2279  ;;  %3737 = vset.pattern.permute.xlu0 %v3910_v30 }
 0x263   : > { %v1604_v59 = vrot.slane %v1596_v39, %v4141_v61  ;;  %v3770_v39 = vld [vmem:[%s4212_s11 + $0x178] sm:$0xff]   ;;  %v1509_v40 = vmul.bf16 %v4615_v43, %v1496_v9  ;;  %v1801_v5 = vmul.bf16 %v4621_v44, %v1788_v26 }
 0x264   : > { %3538 = vmatprep.subr.bf16.mxu0 %v3770_v39 }
 0x265   : > { %v1606_v47 = vmul.bf16 %v4510_v46, %v1604_v59  ;;  %1455 = vperm.xlu1 %3729, %v1451_v41   ;;  %1809 = vrot.lane.b32.xlu0 %v1804_v42, %s3892_s7  ;;  %v1185_v59 = vmul.bf16 %v4615_v43, %v1172_v36 }
 0x266   : > { %v4705_v51 = vpop.permute.xlu0 %2319 }
 0x267   : > { %v1608_v30 = vadd.bf16 %v1606_v47, %v1578_v22  ;;  %v1832_v52 = vpop.permute.xlu1 %1831  ;;  %v3771_v22 = vld [vmem:[%s4212_s11 + $0x138] sm:$0xff]   ;;  %v3772_v47 = vld [vmem:[%s4212_s11 + $0x170] sm:$0xff]  }
 0x268   : > { %v1840_v55 = vrot.slane %v1832_v52, %v4141_v61  ;;  %3539 = vmatpush3.bf16.msra.mxu0 %v3771_v22 }
 0x269   : > { %1467 = vperm.xlu1 %3729, %v1452_v49   ;;  %1613 = vrot.lane.b32.xlu0 %v1608_v30, %s3893_s8  ;;  %v1592_v30 = vrot.slane %v4678_v31, %v4141_v61  ;;  %v1828_v31 = vrot.slane %v4583_v28, %v4141_v61  ;;  %v2328_v28 = vrot.slane %v4705_v51, %v4141_v61 }
 0x26a   : > { %v1842_v7 = vmul.bf16 %v4520_v50, %v1840_v55  ;;  %v3773_v55 = vld [vmem:[%s4212_s11 + $0x130] sm:$0xff]   ;;  %3540 = vmatprep.subr.bf16.mxu0 %v3772_v47  ;;  %v3782_v47 = vld [vmem:[%s4212_s11 + $0x148] sm:$0xff]  }
 0x26b   : > { %v4711_v57 = vpop.permute.xlu1 %1847  ;;  %v4716_v60 = vpop.permute.xlu0 %2095  ;;  %v1605_v11 = vmul.bf16 %v4621_v44, %v1592_v30  ;;  %v2330_v51 = vmul.bf16 %v4510_v46, %v2328_v28 }
 0x26c   : > { %v1872_v62 = vadd.bf16 %v1870_v53, %v1842_v7  ;;  %v2036_v7 = vrot.slane %v4676_v29, %v4141_v61  ;;  %3541 = vmatpush3.bf16.msra.mxu0 %v3773_v55 }
 0x26d   : > { %3732 = vset.pattern.permute.xlu1 %v3912_v34  ;;  %v1951_v34 = vld [vmem:[%s5032_s0] sm:$0xf] }
 0x26e   : > { %1703 = vperm.xlu1 %3732, %v1688_v58   ;;  %1877 = vrot.lane.b32.xlu0 %v1872_v62, %s3893_s8  ;;  %v1564_v58 = vrot.slane %v4664_v18, %v4141_v61  ;;  %v3775_v18 = vld [vmem:[%s4212_s11 + $0x128] sm:$0xff]  }
 0x270   : > { %v4723_v4 = vpop.permute.xlu1 %1623  ;;  %v4725_v54 = vpop.permute.xlu0 %2347 }
 0x272   : > { %1719 = vperm.xlu1 %3732, %v1715_v56   ;;  %v3774_v56 = vld [vmem:[%s4212_s11 + $0x168] sm:$0xff]  }
 0x273   : > { %3542 = vmatprep.subr.bf16.mxu0 %v3774_v56 }
 0x274   : > { %v4727_v6 = vpop.permute.xlu1 %1651  ;;  %v4729_v8 = vpop.permute.xlu0 %2387  ;;  %3543 = vmatpush3.bf16.msra.mxu0 %v3775_v18 }
 0x275   : > { %3544 = vmatprep.subr.bf16.mxu0 %v3776_v19  ;;  %v2396_v18 = vrot.slane %v4729_v8, %v4141_v61 }
 0x276   : > { %3733 = vset.pattern.permute.xlu1 %v3913_v2 }
 0x277   : > { %1955 = vperm.xlu1 %3733, %v1951_v34   ;;  %v1803_v34 = vadd.bf16 %v1801_v5, %v1773_v45 }
 0x278   : > { %v1664_v12 = vpop.permute.xlu1 %1663 }
 0x279   : > { %v1672_v15 = vrot.slane %v1664_v12, %v4141_v61  ;;  %v4742_v63 = vpop.permute.xlu0 %2163  ;;  %v1856_v12 = vrot.slane %v4711_v57, %v4141_v61 }
 0x27b   : > { %v1674_v20 = vmul.bf16 %v4510_v46, %v1672_v15  ;;  %1983 = vperm.xlu1 %3733, %v1979_v13   ;;  %v2038_v13 = vmul.bf16 %v4520_v50, %v2036_v7  ;;  %v1577_v15 = vmul.bf16 %v4615_v43, %v1564_v58  ;;  %v2104_v7 = vrot.slane %v4716_v60, %v4141_v61  ;;  %v3784_v58 = vld [vmem:[%s4212_s11 + $0x140] sm:$0xff]  }
 0x27d   : > { %v1676_v2 = vadd.bf16 %v1674_v20, %v1646_v14  ;;  %v1900_v21 = vpop.permute.xlu1 %1899  ;;  %v1841_v20 = vmul.bf16 %v4615_v43, %v1828_v31 }
 0x27e   : > { %v1908_v24 = vrot.slane %v1900_v21, %v4141_v61  ;;  %v4752_v25 = vpop.permute.xlu0 %2415  ;;  %v1660_v21 = vrot.slane %v4727_v6, %v4141_v61  ;;  %v3778_v6 = vld [vmem:[%s4212_s11 + $0x158] sm:$0xff]  }
 0x27f   : > { %1995 = vperm.xlu1 %3733, %v1980_v48   ;;  %1681 = vrot.lane.b32.xlu0 %v1676_v2, %s3894_s9  ;;  %v1607_v48 = vadd.bf16 %v1605_v11, %v1577_v15  ;;  %v1869_v2 = vmul.bf16 %v4621_v44, %v1856_v12  ;;  %v3786_v15 = vld [vmem:[%s4212_s11 + $0x1f8] sm:$0xff]  }
 0x280   : > { %v1910_v0 = vmul.bf16 %v4520_v50, %v1908_v24  ;;  %v1673_v36 = vmul.bf16 %v4621_v44, %v1660_v21  ;;  %3560 = vmatprep.subr.bf16.mxu1 %v3786_v15 }
 0x281   : > { %v4756_v27 = vpop.permute.xlu1 %1915  ;;  %v1871_v9 = vadd.bf16 %v1869_v2, %v1841_v20  ;;  %v2398_v2 = vmul.bf16 %v4510_v46, %v2396_v18 }
 0x282   : > { %v1940_v35 = vadd.bf16 %v1938_v23, %v1910_v0  ;;  %v4763_v1 = vpop.permute.xlu0 %2455  ;;  %v3777_v23 = vld [vmem:[%s4212_s11 + $0x120] sm:$0xff]   ;;  %v1924_v37 = vrot.slane %v4756_v27, %v4141_v61 }
 0x283   : > { %3736 = vset.pattern.permute.xlu1 %v3914_v16  ;;  %v1537_v16 = vmul.bf16 %v4621_v44, %v1524_v17  ;;  %3545 = vmatpush3.bf16.msra.mxu0 %v3777_v23 }
 0x284   : > { %2231 = vperm.xlu1 %3736, %v2216_v33   ;;  %1945 = vrot.lane.b32.xlu0 %v1940_v35, %s3894_s9  ;;  %v1632_v33 = vrot.slane %v4723_v4, %v4141_v61  ;;  %v1896_v35 = vrot.slane %v4642_v3, %v4141_v61  ;;  %v3780_v3 = vld [vmem:[%s4212_s11 + $0x150] sm:$0xff]  }
 0x285   : > { %v1539_v49 = vadd.bf16 %v1537_v16, %v1509_v40  ;;  %3546 = vmatprep.subr.bf16.mxu0 %v3778_v6  ;;  %v1937_v40 = vmul.bf16 %v4621_v44, %v1924_v37  ;;  %v2172_v37 = vrot.slane %v4742_v63, %v4141_v61 }
 0x286   : > { %v4780_v41 = vpop.permute.xlu1 %2015  ;;  %v1645_v16 = vmul.bf16 %v4615_v43, %v1632_v33  ;;  %v1909_v22 = vmul.bf16 %v4615_v43, %v1896_v35 }
 0x287   : > { %v1192_v42 = vpop.permute.xlu0 %1191 }
 0x288   : > { %v1200_v10 = vrot.slane %v1192_v42, %v4141_v61  ;;  %2247 = vperm.xlu1 %3736, %v2243_v32   ;;  %v3779_v32 = vld [vmem:[%s4212_s11 + $0x118] sm:$0xff]   ;;  %v1675_v42 = vadd.bf16 %v1673_v36, %v1645_v16  ;;  %v1939_v5 = vadd.bf16 %v1937_v40, %v1909_v22  ;;  %v2464_v40 = vrot.slane %v4763_v1, %v4141_v61 }
 0x289   : > { %3547 = vmatpush3.bf16.msra.mxu0 %v3779_v32 }
 0x28a   : > { %v1213_v52 = vmul.bf16 %v4621_v44, %v1200_v10  ;;  %v4792_v53 = vpop.permute.xlu1 %2043  ;;  %v3781_v10 = vld [vmem:[%s4212_s11 + $0x110] sm:$0xff]   ;;  %3548 = vmatprep.subr.bf16.mxu0 %v3780_v3  ;;  %v2174_v3 = vmul.bf16 %v4520_v50, %v2172_v37 }
 0x28b   : > { %v2052_v27 = vrot.slane %v4792_v53, %v4141_v61  ;;  %v3783_v53 = vld [vmem:[%s4212_s11 + $0x108] sm:$0xff]   ;;  %v3789_v37 = vld [vmem:[%s4212_s11 + $0x1b0] sm:$0xff]  }
 0x28c   : > { %v1215_v62 = vadd.bf16 %v1213_v52, %v1185_v59  ;;  %1543 = vrot.lane.b32.xlu1 %v1539_v49, %s3892_s7  ;;  %v2024_v59 = vrot.slane %v4780_v41, %v4141_v61  ;;  %v2288_v49 = vrot.slane %v4693_v38, %v4141_v61 }
 0x28d   : > { %3549 = vmatpush3.bf16.msra.mxu0 %v3781_v10  ;;  %v2065_v30 = vmul.bf16 %v4621_v44, %v2052_v27 }
 0x28e   : > { %1217 = vst.msk [vmem:[#allocation2 + $0xc] sm:$0xf] %vm421_vm0, %v1215_v62  ;;  %v2056_v29 = vpop.permute.xlu1 %2055  ;;  %3550 = vmatprep.subr.bf16.mxu0 %v3782_v47  ;;  %v2037_v55 = vmul.bf16 %v4615_v43, %v2024_v59  ;;  %v2301_v38 = vmul.bf16 %v4615_v43, %v2288_v49 }
 0x28f   : > { %v2064_v14 = vrot.slane %v2056_v29, %v4141_v61  ;;  %v2106_v29 = vmul.bf16 %v4520_v50, %v2104_v7 }
 0x290   : > { %1807 = vrot.lane.b32.xlu1 %v1803_v34, %s3892_s7  ;;  %v2067_v62 = vadd.bf16 %v2065_v30, %v2037_v55  ;;  %v3785_v34 = vld [vmem:[%s4212_s11 + $0x100] sm:$0xff]  }
 0x291   : > { %v2066_v57 = vmul.bf16 %v4510_v46, %v2064_v14  ;;  %3551 = vmatpush3.bf16.msra.mxu0 %v3783_v53 }
 0x292   : > { %3552 = vmatprep.subr.bf16.mxu0 %v3784_v58 }
 0x293   : > { %v2068_v24 = vadd.bf16 %v2066_v57, %v2038_v13  ;;  %v2292_v0 = vpop.permute.xlu1 %2291 }
 0x294   : > { %v2300_v17 = vrot.slane %v2292_v0, %v4141_v61  ;;  %1611 = vrot.lane.b32.xlu1 %v1607_v48, %s3893_s8  ;;  %v2356_v48 = vrot.slane %v4725_v54, %v4141_v61 }
 0x295   : > { %2073 = vrot.lane.b32.xlu0 %v2068_v24, %s3892_s7  ;;  %3553 = vmatpush3.bf16.msra.mxu0 %v3785_v34 }
 0x296   : > { %v2302_v4 = vmul.bf16 %v4520_v50, %v2300_v17  ;;  %v2369_v0 = vmul.bf16 %v4615_v43, %v2356_v48 }
 0x297   : > { %v2308_v39 = vpop.permute.xlu1 %2307 }
 0x298   : > { %v2332_v26 = vadd.bf16 %v2330_v51, %v2302_v4  ;;  %1875 = vrot.lane.b32.xlu1 %v1871_v9, %s3893_s8  ;;  %v2316_v52 = vrot.slane %v2308_v39, %v4141_v61 }
 0x29a   : > { %2337 = vrot.lane.b32.xlu0 %v2332_v26, %s3892_s7  ;;  %v2329_v56 = vmul.bf16 %v4621_v44, %v2316_v52 }
 0x29c   : > { %1679 = vrot.lane.b32.xlu1 %v1675_v42, %s3894_s9  ;;  %v2084_v45 = vpop.permute.xlu1 %2083  ;;  %v2331_v13 = vadd.bf16 %v2329_v56, %v2301_v38 }
 0x29d   : > { %v2092_v11 = vrot.slane %v2084_v45, %v4141_v61  ;;  %v2466_v45 = vmul.bf16 %v4510_v46, %v2464_v40 }
 0x29e   : > { %v1282_v6 = vpop.permute.xlu0 %1281 }
 0x29f   : > { %v2105_v57 = vmul.bf16 %v4615_v43, %v2092_v11 }
 0x2a0   : > { %1943 = vrot.lane.b32.xlu1 %v1939_v5, %s3894_s9  ;;  %v2112_v41 = vpop.permute.xlu1 %2111  ;;  %v2424_v5 = vrot.slane %v4752_v25, %v4141_v61 }
 0x2a1   : > { %v2120_v31 = vrot.slane %v2112_v41, %v4141_v61 }
 0x2a2   : > { %v2437_v55 = vmul.bf16 %v4615_v43, %v2424_v5 }
 0x2a3   : > { %v2133_v14 = vmul.bf16 %v4621_v44, %v2120_v31 }
 0x2a4   : > { %2071 = vrot.lane.b32.xlu1 %v2067_v62, %s3892_s7  ;;  %v2124_v12 = vpop.permute.xlu1 %2123 }
 0x2a5   : > { %v2132_v60 = vrot.slane %v2124_v12, %v4141_v61  ;;  %v2135_v21 = vadd.bf16 %v2133_v14, %v2105_v57 }
 0x2a7   : > { %v2134_v28 = vmul.bf16 %v4510_v46, %v2132_v60 }
 0x2a8   : > { %2335 = vrot.lane.b32.xlu1 %v2331_v13, %s3892_s7  ;;  %s316_s7 = sand.u32 1, %s3858_s18   ;;  %s3490_s18 = sshll.u32 (%p3977_p3), %s3866_s20, 3 }
 0x2a9   : > { %v2136_v19 = vadd.bf16 %v2134_v28, %v2106_v29  ;;  %v2360_v20 = vpop.permute.xlu1 %2359  ;;  %s3225_s27 = scalar_lea.vmem (%p3977_p3), %s5037_s5, %s3490_s18 }
 0x2aa   : > { %v2368_v8 = vrot.slane %v2360_v20, %v4141_v61 }
 0x2ab   : > { %2141 = vrot.lane.b32.xlu0 %v2136_v19, %s3893_s8 }
 0x2ac   : > { %v2370_v23 = vmul.bf16 %v4520_v50, %v2368_v8  ;;  %2139 = vrot.lane.b32.xlu1 %v2135_v21, %s3893_s8 }
 0x2ad   : > { %v2376_v24 = vpop.permute.xlu1 %2375 }
 0x2ae   : > { %v2400_v51 = vadd.bf16 %v2398_v2, %v2370_v23  ;;  %v2384_v33 = vrot.slane %v2376_v24, %v4141_v61 }
 0x2af   : > { %v1350_v4 = vpop.permute.xlu0 %1349 }
 0x2b0   : > { %v2397_v17 = vmul.bf16 %v4621_v44, %v2384_v33  ;;  %2405 = vrot.lane.b32.xlu0 %v2400_v51, %s3893_s8  ;;  %v3787_v33 = vld [vmem:[%s4212_s11 + $0x1b8] sm:$0xff]  }
 0x2b2   : > { %v2399_v54 = vadd.bf16 %v2397_v17, %v2369_v0  ;;  %v2152_v35 = vpop.permute.xlu1 %2151  ;;  %v3788_v17 = vld [vmem:[%s4212_s11 + $0x1f0] sm:$0xff]  }
 0x2b3   : > { %v2160_v9 = vrot.slane %v2152_v35, %v4141_v61 }
 0x2b4   : > { %2403 = vrot.lane.b32.xlu1 %v2399_v54, %s3893_s8  ;;  %v1418_v27 = vpop.permute.xlu0 %1417  ;;  %s3414_s8 = sshll.u32 %s316_s7, 4 }
 0x2b5   : > { %v2173_v39 = vmul.bf16 %v4615_v43, %v2160_v9 }
 0x2b6   : > { %v2180_v36 = vpop.permute.xlu1 %2179 }
 0x2b7   : > { %v2188_v32 = vrot.slane %v2180_v36, %v4141_v61 }
 0x2b9   : > { %v2201_v16 = vmul.bf16 %v4621_v44, %v2188_v32  ;;  %v3790_v32 = vld [vmem:[%s4212_s11 + $0x1e8] sm:$0xff]  }
 0x2ba   : > { %v2192_v26 = vpop.permute.xlu1 %2191 }
 0x2bb   : > { %v2203_v22 = vadd.bf16 %v2201_v16, %v2173_v39  ;;  %v2200_v42 = vrot.slane %v2192_v26, %v4141_v61 }
 0x2bd   : > { %v2202_v10 = vmul.bf16 %v4510_v46, %v2200_v42  ;;  %2207 = vrot.lane.b32.xlu1 %v2203_v22, %s3894_s9  ;;  %v3791_v22 = vld [vmem:[%s4212_s11 + $0x1a8] sm:$0xff]  }
 0x2bf   : > { %v2204_v63 = vadd.bf16 %v2202_v10, %v2174_v3  ;;  %v2428_v59 = vpop.permute.xlu1 %2427  ;;  %v3792_v10 = vld [vmem:[%s4212_s11 + $0x1e0] sm:$0xff]  }
 0x2c0   : > { %v2436_v47 = vrot.slane %v2428_v59, %v4141_v61 }
 0x2c1   : > { %2209 = vrot.lane.b32.xlu0 %v2204_v63, %s3894_s9  ;;  %v1440_v49 = vpop.permute.xlu0 %1439 }
 0x2c2   : > { %v2438_v30 = vmul.bf16 %v4520_v50, %v2436_v47  ;;  %v1448_v20 = vrot.slane %v1440_v49, %v4141_v61  ;;  %v3793_v47 = vld [vmem:[%s4212_s11 + $0x1a0] sm:$0xff]  }
 0x2c3   : > { %v2444_v1 = vpop.permute.xlu1 %2443 }
 0x2c4   : > { %v2468_v52 = vadd.bf16 %v2466_v45, %v2438_v30  ;;  %v2452_v53 = vrot.slane %v2444_v1, %v4141_v61  ;;  %v3794_v1 = vld [vmem:[%s4212_s11 + $0x1d8] sm:$0xff]  }
 0x2c6   : > { %v2465_v41 = vmul.bf16 %v4621_v44, %v2452_v53  ;;  %2473 = vrot.lane.b32.xlu0 %v2468_v52, %s3894_s9  ;;  %v4907_v7 = vpop.permute.xlu0 %1691 }
 0x2c7   : > { %v1700_v42 = vrot.slane %v4907_v7, %v4141_v61 }
 0x2c8   : > { %v2467_v58 = vadd.bf16 %v2465_v41, %v2437_v55  ;;  %v1176_v38 = vpop.permute.xlu1 %1175  ;;  %v3795_v55 = vld [vmem:[%s4212_s11 + $0x198] sm:$0xff]  }
 0x2c9   : > { %v1184_v62 = vrot.slane %v1176_v38, %v4141_v61  ;;  %v1713_v49 = vmul.bf16 %v4615_v43, %v1700_v42 }
 0x2ca   : > { %2471 = vrot.lane.b32.xlu1 %v2467_v58, %s3894_s9  ;;  %v1732_v25 = vpop.permute.xlu0 %1731  ;;  %v3796_v58 = vld [vmem:[%s4212_s11 + $0x1d0] sm:$0xff]   ;;  %s318_s9 = scalar_lea.vmem [#allocation5], %s3414_s8 }
 0x2cb   : > { %v1186_v31 = vmul.bf16 %v4520_v50, %v1184_v62  ;;  %v3797_v62 = vld [vmem:[%s4212_s11 + $0x190] sm:$0xff]  }
 0x2cc   : > { %v1204_v56 = vpop.permute.xlu1 %1203 }
 0x2cd   : > { %v1212_v34 = vrot.slane %v1204_v56, %v4141_v61 }
 0x2cf   : > { %v1214_v11 = vmul.bf16 %v4510_v46, %v1212_v34  ;;  %v4914_v12 = vpop.permute.xlu0 %1967 }
 0x2d0   : > { %v1280_v29 = vpop.permute.xlu1 %1279  ;;  %v1976_v34 = vrot.slane %v4914_v12, %v4141_v61 }
 0x2d1   : > { %v1216_v60 = vadd.bf16 %v1214_v11, %v1186_v31  ;;  %1285 = vst.msk [vmem:[#allocation2 + $0xc] sm:$0xf] %vm490_vm1, %v1280_v29  ;;  %v3798_v31 = vld [vmem:[%s4212_s11 + $0x1c8] sm:$0xff]  }
 0x2d3   : > { %1218 = vst.msk [vmem:[#allocation2 + $0x2c] sm:$0xf] %vm421_vm0, %v1216_v60 }
 0x2d4   : > { %1286 = vst.msk [vmem:[#allocation2 + $0x2c] sm:$0xf] %vm490_vm1, %v1282_v6  ;;  %v4919_v18 = vpop.permute.xlu0 %2219  ;;  %v1348_v13 = vpop.permute.xlu1 %1347  ;;  %v1450_v6 = vmul.bf16 %v4520_v50, %v1448_v20 }
 0x2d5   : > { %1354 = vst.msk [vmem:[#allocation2 + $0x2c] sm:$0xf] %vm559_vm2, %v1350_v4  ;;  %1353 = vst.msk [vmem:[#allocation2 + $0xc] sm:$0xf] %vm559_vm2, %v1348_v13  ;;  %v1740_v4 = vrot.slane %v1732_v25, %v4141_v61  ;;  %v3799_v13 = vld [vmem:[%s4212_s11 + $0x188] sm:$0xff]  }
 0x2d6   : > { %1422 = vst.msk [vmem:[#allocation2 + $0x2c] sm:$0xf] %vm628_vm3, %v1418_v27 }
 0x2d7   : > { %v1742_v40 = vmul.bf16 %v4510_v46, %v1740_v4 }
 0x2d8   : > { %v4924_v14 = vpop.permute.xlu0 %2259  ;;  %v1416_v15 = vpop.permute.xlu1 %1415 }
 0x2d9   : > { %1421 = vst.msk [vmem:[#allocation2 + $0xc] sm:$0xf] %vm628_vm3, %v1416_v15  ;;  %v2268_v12 = vrot.slane %v4924_v14, %v4141_v61 }
 0x2dc   : > { %v1546_v28 = vpop.permute.xlu0 %1545  ;;  %v1428_v57 = vpop.permute.xlu1 %1427 }
 0x2dd   : > { %v1436_v19 = vrot.slane %v1428_v57, %v4141_v61  ;;  %v2619_v21 = vld [vmem:[#allocation2 + $0x28] sm:$0xff]  ;;  %v1978_v57 = vmul.bf16 %v4520_v50, %v1976_v34 }
 0x2df   : > { %v1449_v8 = vmul.bf16 %v4615_v43, %v1436_v19 }
 0x2e0   : > { %v1456_v48 = vpop.permute.xlu1 %1455  ;;  %v2615_v2 = vld [vmem:[#allocation2 + $0x8] sm:$0xff]  ;;  %v1810_v23 = vpop.permute.xlu0 %1809 }
 0x2e1   : > { %v1464_v24 = vrot.slane %v1456_v48, %v4141_v61  ;;  %v3419_v0 = vcombine.low %v2615_v2, %v2619_v21  ;;  %v3420_v51 = vcombine.high %v2615_v2, %v2619_v21  ;;  %v3801_v2 = vld [vmem:[%s4212_s11 + $0x180] sm:$0xff]  }
 0x2e3   : > { %v1477_v54 = vmul.bf16 %v4621_v44, %v1464_v24  ;;  %3119 = vmatprep.mubr.bf16.mxu1 %v3420_v51  ;;  %v2270_v24 = vmul.bf16 %v4510_v46, %v2268_v12 }
 0x2e4   : > { %3120 = vmatmul.mubr.bf16.vlgmr.msra.gmra.mxu1 %v3419_v0  ;;  %v1468_v35 = vpop.permute.xlu1 %1467  ;;  %v1614_v39 = vpop.permute.xlu0 %1613 }
 0x2e5   : > { %v1479_v9 = vadd.bf16 %v1477_v54, %v1449_v8  ;;  %v1476_v36 = vrot.slane %v1468_v35, %v4141_v61  ;;  %3561 = vmatpush3.bf16.msra.mxu1 %v3787_v33 }
 0x2e6   : > { %3562 = vmatprep.subr.bf16.mxu1 %v3788_v17 }
 0x2e7   : > { %1481 = vst.msk [vmem:[#allocation2 + $0x10] sm:$0xf] %vm421_vm0, %v1479_v9  ;;  %v1478_v16 = vmul.bf16 %v4510_v46, %v1476_v36 }
 0x2e8   : > { %v1878_v59 = vpop.permute.xlu0 %1877 }
 0x2e9   : > { %v1480_v26 = vadd.bf16 %v1478_v16, %v1450_v6  ;;  %v1704_v3 = vpop.permute.xlu1 %1703  ;;  %3563 = vmatpush3.bf16.msra.mxu1 %v3789_v37 }
 0x2ea   : > { %v1712_v27 = vrot.slane %v1704_v3, %v4141_v61  ;;  %3564 = vmatprep.subr.bf16.mxu1 %v3790_v32 }
 0x2eb   : > { %1482 = vst.msk [vmem:[#allocation2 + $0x30] sm:$0xf] %vm421_vm0, %v1480_v26 }
 0x2ec   : > { %1550 = vst.msk [vmem:[#allocation2 + $0x30] sm:$0xf] %vm490_vm1, %v1546_v28  ;;  %v1714_v63 = vmul.bf16 %v4520_v50, %v1712_v27  ;;  %v3800_v28 = vld [vmem:[%s4212_s11 + $0x1c0] sm:$0xff]  }
 0x2ed   : > { %1618 = vst.msk [vmem:[#allocation2 + $0x30] sm:$0xf] %vm559_vm2, %v1614_v39  ;;  %v1720_v45 = vpop.permute.xlu1 %1719  ;;  %3565 = vmatpush3.bf16.msra.mxu1 %v3791_v22 }
 0x2ee   : > { %v1744_v5 = vadd.bf16 %v1742_v40, %v1714_v63  ;;  %v1728_v30 = vrot.slane %v1720_v45, %v4141_v61  ;;  %3566 = vmatprep.subr.bf16.mxu1 %v3792_v10 }
 0x2f0   : > { %1746 = vst.msk [vmem:[#allocation2 + $0x34] sm:$0xf] %vm421_vm0, %v1744_v5  ;;  %v1741_v52 = vmul.bf16 %v4621_v44, %v1728_v30  ;;  %v3510_v30 = vpop.f32.mrf.mxu0 }
 0x2f1   : > { %1814 = vst.msk [vmem:[#allocation2 + $0x34] sm:$0xf] %vm490_vm1, %v1810_v23  ;;  %v1682_v53 = vpop.permute.xlu0 %1681  ;;  %3567 = vmatpush3.bf16.msra.mxu1 %v3793_v47  ;;  %v2228_v23 = vrot.slane %v4919_v18, %v4141_v61 }
 0x2f2   : > { %v1743_v41 = vadd.bf16 %v1741_v52, %v1713_v49  ;;  %1882 = vst.msk [vmem:[#allocation2 + $0x34] sm:$0xf] %vm559_vm2, %v1878_v59  ;;  %v1956_v7 = vpop.permute.xlu1 %1955  ;;  %3568 = vmatprep.subr.bf16.mxu1 %v3794_v1  ;;  %v3511_v1 = vpop.f32.mrf.mxu0 }
 0x2f3   : > { %1686 = vst.msk [vmem:[#allocation2 + $0x30] sm:$0xf] %vm628_vm3, %v1682_v53  ;;  %v1964_v38 = vrot.slane %v1956_v7, %v4141_v61  ;;  %v2241_v33 = vmul.bf16 %v4615_v43, %v2228_v23 }
 0x2f4   : > { %1745 = vst.msk [vmem:[#allocation2 + $0x14] sm:$0xf] %vm421_vm0, %v1743_v41  ;;  %v3513_v52 = vpop.f32.mrf.mxu0 }
 0x2f5   : > { %3569 = vmatpush3.bf16.msra.mxu1 %v3795_v55  ;;  %v1977_v11 = vmul.bf16 %v4615_v43, %v1964_v38 }
 0x2f6   : > { %v1946_v25 = vpop.permute.xlu0 %1945  ;;  %v1984_v56 = vpop.permute.xlu1 %1983  ;;  %3570 = vmatprep.subr.bf16.mxu1 %v3796_v58 }
 0x2f7   : > { %1950 = vst.msk [vmem:[#allocation2 + $0x34] sm:$0xf] %vm628_vm3, %v1946_v25  ;;  %v1992_v29 = vrot.slane %v1984_v56, %v4141_v61  ;;  %v3514_v53 = vpop.f32.mrf.mxu0 }
 0x2f9   : > { %v2005_v60 = vmul.bf16 %v4621_v44, %v1992_v29  ;;  %3571 = vmatpush3.bf16.msra.mxu1 %v3797_v62 }
 0x2fa   : > { %v1996_v15 = vpop.permute.xlu1 %1995  ;;  %3572 = vmatprep.subr.bf16.mxu1 %v3798_v31  ;;  %v3512_v31 = vadd.f32 %v3511_v1, %v3510_v30 }
 0x2fb   : > { %v2007_v19 = vadd.bf16 %v2005_v60, %v1977_v11  ;;  %v2004_v20 = vrot.slane %v1996_v15, %v4141_v61 }
 0x2fd   : > { %2009 = vst.msk [vmem:[#allocation2 + $0x18] sm:$0xf] %vm421_vm0, %v2007_v19  ;;  %v2006_v48 = vmul.bf16 %v4510_v46, %v2004_v20  ;;  %3573 = vmatpush3.bf16.msra.mxu1 %v3799_v13 }
 0x2fe   : > { %3574 = vmatprep.subr.bf16.mxu1 %v3800_v28  ;;  %v2620_v26 = vld [vmem:[#allocation2 + $0x30] sm:$0xff]  ;;  %v3515_v28 = vadd.f32 %v3514_v53, %v3513_v52 }
 0x2ff   : > { %v2008_v21 = vadd.bf16 %v2006_v48, %v1978_v57  ;;  %v2232_v8 = vpop.permute.xlu1 %2231 }
 0x300   : > { %v2240_v0 = vrot.slane %v2232_v8, %v4141_v61 }
 0x301   : > { %2010 = vst.msk [vmem:[#allocation2 + $0x38] sm:$0xf] %vm421_vm0, %v2008_v21  ;;  %3575 = vmatpush3.bf16.msra.mxu1 %v3801_v2 }
 0x302   : > { %v2242_v14 = vmul.bf16 %v4520_v50, %v2240_v0 }
 0x303   : > { %v2248_v51 = vpop.permute.xlu1 %2247 }
 0x304   : > { %v2272_v17 = vadd.bf16 %v2270_v24, %v2242_v14  ;;  %v2256_v54 = vrot.slane %v2248_v51, %v4141_v61 }
 0x306   : > { %2274 = vst.msk [vmem:[#allocation2 + $0x3c] sm:$0xf] %vm421_vm0, %v2272_v17  ;;  %v2269_v35 = vmul.bf16 %v4621_v44, %v2256_v54 }
 0x307   : > { %v2074_v18 = vpop.permute.xlu0 %2073  ;;  %v1544_v6 = vpop.permute.xlu1 %1543 }
 0x308   : > { %v2271_v46 = vadd.bf16 %v2269_v35, %v2241_v33  ;;  %2078 = vst.msk [vmem:[#allocation2 + $0x38] sm:$0xf] %vm490_vm1, %v2074_v18  ;;  %1549 = vst.msk [vmem:[#allocation2 + $0x10] sm:$0xf] %vm490_vm1, %v1544_v6 }
 0x30a   : > { %2273 = vst.msk [vmem:[#allocation2 + $0x1c] sm:$0xf] %vm421_vm0, %v2271_v46 }
 0x30b   : > { %v1808_v50 = vpop.permute.xlu1 %1807 }
 0x30c   : > { %1813 = vst.msk [vmem:[#allocation2 + $0x14] sm:$0xf] %vm490_vm1, %v1808_v50  ;;  %v2338_v43 = vpop.permute.xlu0 %2337 }
 0x30d   : > { %2342 = vst.msk [vmem:[#allocation2 + $0x3c] sm:$0xf] %vm490_vm1, %v2338_v43 }
 0x30f   : > { %v1612_v61 = vpop.permute.xlu1 %1611 }
 0x310   : > { %1617 = vst.msk [vmem:[#allocation2 + $0x10] sm:$0xf] %vm559_vm2, %v1612_v61 }
 0x313   : > { %v1876_v9 = vpop.permute.xlu1 %1875 }
 0x314   : > { %1881 = vst.msk [vmem:[#allocation2 + $0x14] sm:$0xf] %vm559_vm2, %v1876_v9 }
 0x317   : > { %v1680_v44 = vpop.permute.xlu1 %1679 }
 0x318   : > { %1685 = vst.msk [vmem:[#allocation2 + $0x10] sm:$0xf] %vm628_vm3, %v1680_v44 }
 0x31b   : > { %v1944_v36 = vpop.permute.xlu1 %1943 }
 0x31c   : > { %1949 = vst.msk [vmem:[#allocation2 + $0x14] sm:$0xf] %vm628_vm3, %v1944_v36 }
 0x31d   : > { %v2142_v37 = vpop.permute.xlu0 %2141 }
 0x31e   : > { %2146 = vst.msk [vmem:[#allocation2 + $0x38] sm:$0xf] %vm559_vm2, %v2142_v37 }
 0x31f   : > { %v2072_v4 = vpop.permute.xlu1 %2071 }
 0x320   : > { %2077 = vst.msk [vmem:[#allocation2 + $0x18] sm:$0xf] %vm490_vm1, %v2072_v4 }
 0x322   : > { %v2406_v32 = vpop.permute.xlu0 %2405 }
 0x323   : > { %2410 = vst.msk [vmem:[#allocation2 + $0x3c] sm:$0xf] %vm559_vm2, %v2406_v32  ;;  %v2336_v39 = vpop.permute.xlu1 %2335  ;;  %v2616_v16 = vld [vmem:[#allocation2 + $0x10] sm:$0xff] }
 0x324   : > { %2341 = vst.msk [vmem:[#allocation2 + $0x1c] sm:$0xf] %vm490_vm1, %v2336_v39  ;;  %v3421_v3 = vcombine.low %v2616_v16, %v2620_v26  ;;  %v3422_v22 = vcombine.high %v2616_v16, %v2620_v26 }
 0x326   : > { %3160 = vmatprep.mubr.bf16.mxu0 %v3422_v22 }
 0x327   : > { %v2140_v42 = vpop.permute.xlu1 %2139  ;;  %3161 = vmatmul.mubr.bf16.vlgmr.msra.gmra.mxu0 %v3421_v3 }
 0x328   : > { %2145 = vst.msk [vmem:[#allocation2 + $0x18] sm:$0xf] %vm559_vm2, %v2140_v42 }
 0x32b   : > { %v2404_v40 = vpop.permute.xlu1 %2403 }
 0x32c   : > { %2409 = vst.msk [vmem:[#allocation2 + $0x1c] sm:$0xf] %vm559_vm2, %v2404_v40 }
 0x32f   : > { %v2208_v27 = vpop.permute.xlu1 %2207 }
 0x330   : > { %2213 = vst.msk [vmem:[#allocation2 + $0x18] sm:$0xf] %vm628_vm3, %v2208_v27 }
 0x333   : > { %v2210_v10 = vpop.permute.xlu0 %2209 }
 0x334   : > { %2214 = vst.msk [vmem:[#allocation2 + $0x38] sm:$0xf] %vm628_vm3, %v2210_v10 }
 0x338   : > { %v2474_v63 = vpop.permute.xlu0 %2473 }
 0x339   : > { %2478 = vst.msk [vmem:[#allocation2 + $0x3c] sm:$0xf] %vm628_vm3, %v2474_v63 }
 0x33c   : > { %v2472_v59 = vpop.permute.xlu1 %2471 }
 0x33d   : > { %2477 = vst.msk [vmem:[#allocation2 + $0x1c] sm:$0xf] %vm628_vm3, %v2472_v59 }
 0x340   : > { %v2621_v47 = vld [vmem:[#allocation2 + $0x38] sm:$0xff] }
 0x344   : > { %v2617_v45 = vld [vmem:[#allocation2 + $0x18] sm:$0xff] }
 0x345   : > { %v3423_v49 = vcombine.low %v2617_v45, %v2621_v47  ;;  %v3424_v5 = vcombine.high %v2617_v45, %v2621_v47 }
 0x347   : > { %3201 = vmatprep.mubr.bf16.mxu1 %v3424_v5 }
 0x348   : > { %3202 = vmatmul.mubr.bf16.vlgmr.msra.gmra.mxu1 %v3423_v49 }
 0x3a4   : > { %v3532_v55 = vpop.f32.mrf.mxu1 }
 0x3a6   : > { %v3533_v7 = vpop.f32.mrf.mxu1 }
 0x3a7   : > { %v3534_v25 = vadd.f32 %v3533_v7, %v3532_v55 }
 0x3a8   : > { %v3535_v38 = vpop.f32.mrf.mxu1 }
 0x3a9   : > { %v3122_v60 = vadd.f32 %v3534_v25, %v3512_v31 }
 0x3aa   : > { %v3536_v56 = vpop.f32.mrf.mxu1 }
 0x3ab   : > { %v3537_v13 = vadd.f32 %v3536_v56, %v3535_v38 }
 0x3ad   : > { %v3125_v48 = vadd.f32 %v3537_v13, %v3515_v28 }
 0x3e7   : > { %v3554_v41 = vpop.f32.mrf.mxu0 }
 0x3e9   : > { %v3555_v58 = vpop.f32.mrf.mxu0 }
 0x3ea   : > { %v3556_v34 = vadd.f32 %v3555_v58, %v3554_v41 }
 0x3eb   : > { %v3557_v62 = vpop.f32.mrf.mxu0 }
 0x3ec   : > { %v3163_v57 = vadd.f32 %v3556_v34, %v3122_v60 }
 0x3ed   : > { %v3558_v11 = vpop.f32.mrf.mxu0 }
 0x3ee   : > { %v3559_v19 = vadd.f32 %v3558_v11, %v3557_v62 }
 0x3f0   : > { %v3166_v8 = vadd.f32 %v3559_v19, %v3125_v48 }
 0x408   : > { %v3576_v29 = vpop.f32.mrf.mxu1 }
 0x40a   : > { %v3577_v15 = vpop.f32.mrf.mxu1 }
 0x40b   : > { %v3578_v20 = vadd.f32 %v3577_v15, %v3576_v29 }
 0x40c   : > { %v3579_v12 = vpop.f32.mrf.mxu1 }
 0x40d   : > { %v3204_v2 = vadd.f32 %v3578_v20, %v3163_v57 }
 0x40e   : > { %v3580_v21 = vpop.f32.mrf.mxu1 }
 0x40f   : > { %v3581_v23 = vadd.f32 %v3580_v21, %v3579_v12  ;;  %3212 = vst [vmem:[%s318_s9] sm:$0xff] %v3204_v2  ;;  %3220 = sbr.rel (!%p3977_p3) target bundleno = 1052 (0x41c), region = 52 }
 0x411   : > { %v3207_v24 = vadd.f32 %v3581_v23, %v3166_v8 }
 0x413   : > { %3213 = vst [vmem:[%s318_s9 + $0x8] sm:$0xff] %v3207_v24 }
 0x416   : > { %v3256_v0 = vld [vmem:[%s318_s9] sm:$0xff] }
 0x417   : > { %3257 = vst [vmem:[%s3225_s27] sm:$0xff] %v3256_v0 }
 0x41a   : > { %v3258_v14 = vld [vmem:[%s318_s9 + $0x8] sm:$0xff] }
 0x41b   : > { %3259 = vst [vmem:[%s3225_s27 + $0x10] sm:$0xff] %v3258_v14 }
 0x41c PF: > { %s16_s22 = sadd.s32 1, %s3874_s22   ;;  %s5041_s18 = smov %s3862_s19 }
 0x41d   : > { %p13_p6 = scmp.ge.s32.totalorder %s16_s22, 4   ;;  %s5042_s19 = smov %s3994_s30 }
 0x41e   : > { %s5043_s20 = smov %s3870_s21  ;;  %s5044_s21 = smov %s5046_s24 }
 0x41f   :  { %15 = sbr.rel (!%p13_p6) target bundleno = 3 (0x3), region = 127 }
 0x424   :  { %3275 = vsyncpa [#allocation4], 1 }
 0x425   :  { %3277 = vsyncpa [#allocation4 + $0x1], 1 }

</bundles_post_ra>
